<compile_context>
chip_gen: v6e
topology: v6e:2x2x1
jax: 0.10.0
libtpu: 0.0.40
codegen_flags: <defaults>
</compile_context>

<pallas_src>
import functools

import jax
import jax.numpy as jnp
from jax import lax
from jax.experimental import pallas as pl
from jax.experimental.pallas import tpu as pltpu

C_IN, C_OUT, K = 3, 8, 3


def _conv_sub_kernel(w_ref, b_ref, mask_ref, x_ref, other_ref, o_ref,
                     *, n_blk, H, W):
    # w_ref:     VMEM (C_OUT, C_IN*K*K)        col idx = ci*K*K + kh*K + kw
    # b_ref:     VMEM (C_OUT, 1)
    # mask_ref:  VMEM (K*K, H*W)               per-tap border masks (0/1 floats)
    # x_ref:     VMEM (1, n_blk*C_IN, H*W)     n_blk batch elems, flattened
    # other_ref: VMEM (1, n_blk*C_OUT, H*W)
    # o_ref:     VMEM (1, n_blk*C_OUT, H*W)
    HW = H * W

    x_all = x_ref[0]          # (n_blk*C_IN, HW)
    w = w_ref[...]            # (C_OUT, C_IN*K*K)  -- hoisted single load
    bias = b_ref[...]         # (C_OUT, 1)
    masks = mask_ref[...]     # (K*K, HW)

    # parts[b][ci]: conv contribution of input channel ci of batch b.
    # n_blk*C_IN independent FMA chains -> better VLIW slot packing than one
    # long serial accumulator chain.
    parts = [[None] * C_IN for _ in range(n_blk)]

    for kh in range(K):
        dh = kh - 1
        for kw in range(K):
            dw = kw - 1
            tap = kh * K + kw
            s = dh * W + dw                      # flat-index offset of this tap
            if s == 0:
                shifted = x_all
            else:
                # shifted[i] = x_all[(i + s) mod HW]  (jnp.roll semantics)
                shifted = pltpu.roll(x_all, shift=(-s) % HW, axis=1)
            if not (dh == 0 and dw == 0):
                # Zero positions whose tap falls outside the image (handles the
                # top/bottom rows and the row-edge lane wrap).  Mask is host
                # precomputed: no int div/mod on the VPU.
                shifted = shifted * masks[tap:tap + 1, :]

            for b in range(n_blk):
                for ci in range(C_IN):
                    col = ci * K * K + tap
                    row = b * C_IN + ci
                    # One vector FMA per (b, ci, tap): (C_OUT,1)x(1,HW)->(C_OUT,HW)
                    term = w[:, col:col + 1] * shifted[row:row + 1, :]
                    parts[b][ci] = term if parts[b][ci] is None else parts[b][ci] + term

    for b in range(n_blk):
        conv_b = parts[b][0] + parts[b][1] + parts[b][2] + bias       # (C_OUT, HW)
        o_ref[0, b * C_OUT:(b + 1) * C_OUT, :] = (
            other_ref[0, b * C_OUT:(b + 1) * C_OUT, :] - conv_b)


def conv_sub(x, other, weight, bias, *, n_blk=None):
    """Computes other - conv2d(x, weight, bias, stride=1, padding=1)."""
    N, cin, H, W = x.shape
    assert cin == C_IN
    assert other.shape == (N, C_OUT, H, W)
    HW = H * W

    if n_blk is None:
        # Tiny batch: one fused grid step (per-step overhead dominates).
        # Larger batch: keep >=2 parallel steps so both v7x TensorCores work.
        n_blk = N if N <= 2 else pl.cdiv(N, 2)
    n_steps = pl.cdiv(N, n_blk)
    N_pad = n_steps * n_blk

    x32 = x.astype(jnp.float32)
    other32 = other.astype(jnp.float32)
    if N_pad != N:
        x32 = jnp.pad(x32, ((0, N_pad - N), (0, 0), (0, 0), (0, 0)))
        other32 = jnp.pad(other32, ((0, N_pad - N), (0, 0), (0, 0), (0, 0)))

    # Batch folded onto the sublane axis; spatial flattened onto the lane axis.
    x_flat = x32.reshape(n_steps, n_blk * C_IN, HW)
    other_flat = other32.reshape(n_steps, n_blk * C_OUT, HW)
    w2 = weight.reshape(C_OUT, C_IN * K * K).astype(jnp.float32)
    b2 = bias.reshape(C_OUT, 1).astype(jnp.float32)

    # Host-precomputed per-tap border masks: (K*K, HW) of 0/1 floats.
    flat = jnp.arange(HW, dtype=jnp.int32)
    row = flat // W
    col = flat % W
    mask_rows = []
    for kh in range(K):
        dh = kh - 1
        for kw in range(K):
            dw = kw - 1
            m = jnp.ones((HW,), jnp.float32)
            if dh == -1:
                m = m * (row >= 1)
            elif dh == 1:
                m = m * (row < H - 1)
            if dw == -1:
                m = m * (col >= 1)
            elif dw == 1:
                m = m * (col < W - 1)
            mask_rows.append(m)
    mask_arr = jnp.stack(mask_rows, axis=0)          # (K*K, HW)

    kernel = functools.partial(_conv_sub_kernel, n_blk=n_blk, H=H, W=W)

    out_flat = pl.pallas_call(
        kernel,
        out_shape=jax.ShapeDtypeStruct((n_steps, n_blk * C_OUT, HW), jnp.float32),
        grid=(n_steps,),
        in_specs=[
            pl.BlockSpec((C_OUT, C_IN * K * K), lambda n: (0, 0)),       # weights (resident)
            pl.BlockSpec((C_OUT, 1), lambda n: (0, 0)),                  # bias (resident)
            pl.BlockSpec((K * K, HW), lambda n: (0, 0)),                 # border masks (resident)
            pl.BlockSpec((1, n_blk * C_IN, HW), lambda n: (n, 0, 0)),    # x
            pl.BlockSpec((1, n_blk * C_OUT, HW), lambda n: (n, 0, 0)),   # other
        ],
        out_specs=pl.BlockSpec((1, n_blk * C_OUT, HW), lambda n: (n, 0, 0)),
        compiler_params=pltpu.CompilerParams(
            dimension_semantics=("parallel",)),
    )(w2, b2, mask_arr, x_flat, other_flat)

    return out_flat.reshape(N_pad, C_OUT, H, W)[:N]


def _reference(x, other, weight, bias):
    conv = lax.conv_general_dilated(
        x, weight,
        window_strides=(1, 1),
        padding=((1, 1), (1, 1)),
        dimension_numbers=("NCHW", "OIHW", "NCHW"),
    ) + bias.reshape(1, C_OUT, 1, 1)
    return other - conv


if __name__ == "__main__":
    key = jax.random.PRNGKey(0)
    k_x, k_o, k_w, k_b = jax.random.split(key, 4)

    N, H, W = 2, 16, 16
    x = jax.random.normal(k_x, (N, C_IN, H, W), dtype=jnp.float32)
    # NOTE: the original script's `other` was (1, 3, 64, 64), which does not
    # broadcast against the (N, 8, H, W) conv output (that's why it jit-failed);
    # here `other` is given the conv-output shape so `other - conv(x)` is valid.
    other = jax.random.normal(k_o, (N, C_OUT, H, W), dtype=jnp.float32)

    # Deterministic Conv2d(3, 8, 3) parameters (kaiming-uniform-like bounds).
    fan_in = C_IN * K * K
    bound = 1.0 / (fan_in ** 0.5)
    weight = jax.random.uniform(
        k_w, (C_OUT, C_IN, K, K), minval=-bound, maxval=bound, dtype=jnp.float32)
    bias = jax.random.uniform(
        k_b, (C_OUT,), minval=-bound, maxval=bound, dtype=jnp.float32)

    out = conv_sub(x, other, weight, bias)
    out = jax.block_until_ready(out)

    ref = _reference(x, other, weight, bias)
    assert jnp.allclose(out, ref, atol=1e-5, rtol=1e-5), "mismatch vs reference"

    print("KERNEL_OK")
</pallas_src>

<mosaic_0001>
module attributes {stable_mosaic.version = 11 : i64} {
  func.func @_conv_sub_kernel(%arg0: i32, %arg1: memref<8x27xf32, #tpu.memory_space<vmem>>, %arg2: memref<8x1xf32, #tpu.memory_space<vmem>>, %arg3: memref<9x256xf32, #tpu.memory_space<vmem>>, %arg4: memref<1x6x256xf32, #tpu.memory_space<vmem>>, %arg5: memref<1x16x256xf32, #tpu.memory_space<vmem>>, %arg6: memref<1x16x256xf32, #tpu.memory_space<vmem>>) attributes {dimension_semantics = [#tpu.dimension_semantics<parallel>], iteration_bounds = array<i64: 1>, scalar_prefetch = 0 : i64, scratch_operands = 0 : i64, tpu.core_type = #tpu.core_type<tc>, window_params = [{pipeline_mode = #tpu.pipeline_mode<synchronous>, transform_indices = @transform_0, window_bounds = array<i64: 8, 27>}, {pipeline_mode = #tpu.pipeline_mode<synchronous>, transform_indices = @transform_1, window_bounds = array<i64: 8, 1>}, {pipeline_mode = #tpu.pipeline_mode<synchronous>, transform_indices = @transform_2, window_bounds = array<i64: 9, 256>}, {transform_indices = @transform_3, window_bounds = array<i64: 1, 6, 256>}, {transform_indices = @transform_4, window_bounds = array<i64: 1, 16, 256>}, {transform_indices = @transform_5, window_bounds = array<i64: 1, 16, 256>}]} {
    %c0 = arith.constant 0 : index
    %c0_0 = arith.constant 0 : index
    %c0_1 = arith.constant 0 : index
    %0 = vector.load %arg4[%c0, %c0_0, %c0_1] : memref<1x6x256xf32, #tpu.memory_space<vmem>>, vector<1x6x256xf32>
    %1 = vector.shape_cast %0 : vector<1x6x256xf32> to vector<6x256xf32>
    %c0_2 = arith.constant 0 : index
    %c0_3 = arith.constant 0 : index
    %2 = vector.load %arg1[%c0_2, %c0_3] : memref<8x27xf32, #tpu.memory_space<vmem>>, vector<8x27xf32>
    %c0_4 = arith.constant 0 : index
    %c0_5 = arith.constant 0 : index
    %3 = vector.load %arg2[%c0_4, %c0_5] : memref<8x1xf32, #tpu.memory_space<vmem>>, vector<8x1xf32>
    %c0_6 = arith.constant 0 : index
    %c0_7 = arith.constant 0 : index
    %4 = vector.load %arg3[%c0_6, %c0_7] : memref<9x256xf32, #tpu.memory_space<vmem>>, vector<9x256xf32>
    %c17_i32 = arith.constant 17 : i32
    %5 = tpu.dynamic_rotate %1 by %c17_i32 dim 1 : vector<6x256xf32>, i32 -> vector<6x256xf32>
    %6 = vector.extract_strided_slice %4 {offsets = [0, 0], sizes = [1, 256], strides = [1, 1]} : vector<9x256xf32> to vector<1x256xf32>
    %7 = vector.broadcast %6 : vector<1x256xf32> to vector<6x256xf32>
    %8 = arith.mulf %5, %7 : vector<6x256xf32>
    %9 = vector.extract_strided_slice %2 {offsets = [0, 0], sizes = [8, 1], strides = [1, 1]} : vector<8x27xf32> to vector<8x1xf32>
    %10 = vector.extract_strided_slice %8 {offsets = [0, 0], sizes = [1, 256], strides = [1, 1]} : vector<6x256xf32> to vector<1x256xf32>
    %11 = vector.broadcast %9 : vector<8x1xf32> to vector<8x256xf32>
    %12 = vector.broadcast %10 : vector<1x256xf32> to vector<8x256xf32>
    %13 = arith.mulf %11, %12 : vector<8x256xf32>
    %14 = vector.extract_strided_slice %2 {offsets = [0, 9], sizes = [8, 1], strides = [1, 1]} : vector<8x27xf32> to vector<8x1xf32>
    %15 = vector.extract_strided_slice %8 {offsets = [1, 0], sizes = [1, 256], strides = [1, 1]} : vector<6x256xf32> to vector<1x256xf32>
    %16 = vector.broadcast %14 : vector<8x1xf32> to vector<8x256xf32>
    %17 = vector.broadcast %15 : vector<1x256xf32> to vector<8x256xf32>
    %18 = arith.mulf %16, %17 : vector<8x256xf32>
    %19 = vector.extract_strided_slice %2 {offsets = [0, 18], sizes = [8, 1], strides = [1, 1]} : vector<8x27xf32> to vector<8x1xf32>
    %20 = vector.extract_strided_slice %8 {offsets = [2, 0], sizes = [1, 256], strides = [1, 1]} : vector<6x256xf32> to vector<1x256xf32>
    %21 = vector.broadcast %19 : vector<8x1xf32> to vector<8x256xf32>
    %22 = vector.broadcast %20 : vector<1x256xf32> to vector<8x256xf32>
    %23 = arith.mulf %21, %22 : vector<8x256xf32>
    %24 = vector.extract_strided_slice %2 {offsets = [0, 0], sizes = [8, 1], strides = [1, 1]} : vector<8x27xf32> to vector<8x1xf32>
    %25 = vector.extract_strided_slice %8 {offsets = [3, 0], sizes = [1, 256], strides = [1, 1]} : vector<6x256xf32> to vector<1x256xf32>
    %26 = vector.broadcast %24 : vector<8x1xf32> to vector<8x256xf32>
    %27 = vector.broadcast %25 : vector<1x256xf32> to vector<8x256xf32>
    %28 = arith.mulf %26, %27 : vector<8x256xf32>
    %29 = vector.extract_strided_slice %2 {offsets = [0, 9], sizes = [8, 1], strides = [1, 1]} : vector<8x27xf32> to vector<8x1xf32>
    %30 = vector.extract_strided_slice %8 {offsets = [4, 0], sizes = [1, 256], strides = [1, 1]} : vector<6x256xf32> to vector<1x256xf32>
    %31 = vector.broadcast %29 : vector<8x1xf32> to vector<8x256xf32>
    %32 = vector.broadcast %30 : vector<1x256xf32> to vector<8x256xf32>
    %33 = arith.mulf %31, %32 : vector<8x256xf32>
    %34 = vector.extract_strided_slice %2 {offsets = [0, 18], sizes = [8, 1], strides = [1, 1]} : vector<8x27xf32> to vector<8x1xf32>
    %35 = vector.extract_strided_slice %8 {offsets = [5, 0], sizes = [1, 256], strides = [1, 1]} : vector<6x256xf32> to vector<1x256xf32>
    %36 = vector.broadcast %34 : vector<8x1xf32> to vector<8x256xf32>
    %37 = vector.broadcast %35 : vector<1x256xf32> to vector<8x256xf32>
    %38 = arith.mulf %36, %37 : vector<8x256xf32>
    %c16_i32 = arith.constant 16 : i32
    %39 = tpu.dynamic_rotate %1 by %c16_i32 dim 1 : vector<6x256xf32>, i32 -> vector<6x256xf32>
    %40 = vector.extract_strided_slice %4 {offsets = [1, 0], sizes = [1, 256], strides = [1, 1]} : vector<9x256xf32> to vector<1x256xf32>
    %41 = vector.broadcast %40 : vector<1x256xf32> to vector<6x256xf32>
    %42 = arith.mulf %39, %41 : vector<6x256xf32>
    %43 = vector.extract_strided_slice %2 {offsets = [0, 1], sizes = [8, 1], strides = [1, 1]} : vector<8x27xf32> to vector<8x1xf32>
    %44 = vector.extract_strided_slice %42 {offsets = [0, 0], sizes = [1, 256], strides = [1, 1]} : vector<6x256xf32> to vector<1x256xf32>
    %45 = vector.broadcast %43 : vector<8x1xf32> to vector<8x256xf32>
    %46 = vector.broadcast %44 : vector<1x256xf32> to vector<8x256xf32>
    %47 = arith.mulf %45, %46 : vector<8x256xf32>
    %48 = arith.addf %13, %47 : vector<8x256xf32>
    %49 = vector.extract_strided_slice %2 {offsets = [0, 10], sizes = [8, 1], strides = [1, 1]} : vector<8x27xf32> to vector<8x1xf32>
    %50 = vector.extract_strided_slice %42 {offsets = [1, 0], sizes = [1, 256], strides = [1, 1]} : vector<6x256xf32> to vector<1x256xf32>
    %51 = vector.broadcast %49 : vector<8x1xf32> to vector<8x256xf32>
    %52 = vector.broadcast %50 : vector<1x256xf32> to vector<8x256xf32>
    %53 = arith.mulf %51, %52 : vector<8x256xf32>
    %54 = arith.addf %18, %53 : vector<8x256xf32>
    %55 = vector.extract_strided_slice %2 {offsets = [0, 19], sizes = [8, 1], strides = [1, 1]} : vector<8x27xf32> to vector<8x1xf32>
    %56 = vector.extract_strided_slice %42 {offsets = [2, 0], sizes = [1, 256], strides = [1, 1]} : vector<6x256xf32> to vector<1x256xf32>
    %57 = vector.broadcast %55 : vector<8x1xf32> to vector<8x256xf32>
    %58 = vector.broadcast %56 : vector<1x256xf32> to vector<8x256xf32>
    %59 = arith.mulf %57, %58 : vector<8x256xf32>
    %60 = arith.addf %23, %59 : vector<8x256xf32>
    %61 = vector.extract_strided_slice %2 {offsets = [0, 1], sizes = [8, 1], strides = [1, 1]} : vector<8x27xf32> to vector<8x1xf32>
    %62 = vector.extract_strided_slice %42 {offsets = [3, 0], sizes = [1, 256], strides = [1, 1]} : vector<6x256xf32> to vector<1x256xf32>
    %63 = vector.broadcast %61 : vector<8x1xf32> to vector<8x256xf32>
    %64 = vector.broadcast %62 : vector<1x256xf32> to vector<8x256xf32>
    %65 = arith.mulf %63, %64 : vector<8x256xf32>
    %66 = arith.addf %28, %65 : vector<8x256xf32>
    %67 = vector.extract_strided_slice %2 {offsets = [0, 10], sizes = [8, 1], strides = [1, 1]} : vector<8x27xf32> to vector<8x1xf32>
    %68 = vector.extract_strided_slice %42 {offsets = [4, 0], sizes = [1, 256], strides = [1, 1]} : vector<6x256xf32> to vector<1x256xf32>
    %69 = vector.broadcast %67 : vector<8x1xf32> to vector<8x256xf32>
    %70 = vector.broadcast %68 : vector<1x256xf32> to vector<8x256xf32>
    %71 = arith.mulf %69, %70 : vector<8x256xf32>
    %72 = arith.addf %33, %71 : vector<8x256xf32>
    %73 = vector.extract_strided_slice %2 {offsets = [0, 19], sizes = [8, 1], strides = [1, 1]} : vector<8x27xf32> to vector<8x1xf32>
    %74 = vector.extract_strided_slice %42 {offsets = [5, 0], sizes = [1, 256], strides = [1, 1]} : vector<6x256xf32> to vector<1x256xf32>
    %75 = vector.broadcast %73 : vector<8x1xf32> to vector<8x256xf32>
    %76 = vector.broadcast %74 : vector<1x256xf32> to vector<8x256xf32>
    %77 = arith.mulf %75, %76 : vector<8x256xf32>
    %78 = arith.addf %38, %77 : vector<8x256xf32>
    %c15_i32 = arith.constant 15 : i32
    %79 = tpu.dynamic_rotate %1 by %c15_i32 dim 1 : vector<6x256xf32>, i32 -> vector<6x256xf32>
    %80 = vector.extract_strided_slice %4 {offsets = [2, 0], sizes = [1, 256], strides = [1, 1]} : vector<9x256xf32> to vector<1x256xf32>
    %81 = vector.broadcast %80 : vector<1x256xf32> to vector<6x256xf32>
    %82 = arith.mulf %79, %81 : vector<6x256xf32>
    %83 = vector.extract_strided_slice %2 {offsets = [0, 2], sizes = [8, 1], strides = [1, 1]} : vector<8x27xf32> to vector<8x1xf32>
    %84 = vector.extract_strided_slice %82 {offsets = [0, 0], sizes = [1, 256], strides = [1, 1]} : vector<6x256xf32> to vector<1x256xf32>
    %85 = vector.broadcast %83 : vector<8x1xf32> to vector<8x256xf32>
    %86 = vector.broadcast %84 : vector<1x256xf32> to vector<8x256xf32>
    %87 = arith.mulf %85, %86 : vector<8x256xf32>
    %88 = arith.addf %48, %87 : vector<8x256xf32>
    %89 = vector.extract_strided_slice %2 {offsets = [0, 11], sizes = [8, 1], strides = [1, 1]} : vector<8x27xf32> to vector<8x1xf32>
    %90 = vector.extract_strided_slice %82 {offsets = [1, 0], sizes = [1, 256], strides = [1, 1]} : vector<6x256xf32> to vector<1x256xf32>
    %91 = vector.broadcast %89 : vector<8x1xf32> to vector<8x256xf32>
    %92 = vector.broadcast %90 : vector<1x256xf32> to vector<8x256xf32>
    %93 = arith.mulf %91, %92 : vector<8x256xf32>
    %94 = arith.addf %54, %93 : vector<8x256xf32>
    %95 = vector.extract_strided_slice %2 {offsets = [0, 20], sizes = [8, 1], strides = [1, 1]} : vector<8x27xf32> to vector<8x1xf32>
    %96 = vector.extract_strided_slice %82 {offsets = [2, 0], sizes = [1, 256], strides = [1, 1]} : vector<6x256xf32> to vector<1x256xf32>
    %97 = vector.broadcast %95 : vector<8x1xf32> to vector<8x256xf32>
    %98 = vector.broadcast %96 : vector<1x256xf32> to vector<8x256xf32>
    %99 = arith.mulf %97, %98 : vector<8x256xf32>
    %100 = arith.addf %60, %99 : vector<8x256xf32>
    %101 = vector.extract_strided_slice %2 {offsets = [0, 2], sizes = [8, 1], strides = [1, 1]} : vector<8x27xf32> to vector<8x1xf32>
    %102 = vector.extract_strided_slice %82 {offsets = [3, 0], sizes = [1, 256], strides = [1, 1]} : vector<6x256xf32> to vector<1x256xf32>
    %103 = vector.broadcast %101 : vector<8x1xf32> to vector<8x256xf32>
    %104 = vector.broadcast %102 : vector<1x256xf32> to vector<8x256xf32>
    %105 = arith.mulf %103, %104 : vector<8x256xf32>
    %106 = arith.addf %66, %105 : vector<8x256xf32>
    %107 = vector.extract_strided_slice %2 {offsets = [0, 11], sizes = [8, 1], strides = [1, 1]} : vector<8x27xf32> to vector<8x1xf32>
    %108 = vector.extract_strided_slice %82 {offsets = [4, 0], sizes = [1, 256], strides = [1, 1]} : vector<6x256xf32> to vector<1x256xf32>
    %109 = vector.broadcast %107 : vector<8x1xf32> to vector<8x256xf32>
    %110 = vector.broadcast %108 : vector<1x256xf32> to vector<8x256xf32>
    %111 = arith.mulf %109, %110 : vector<8x256xf32>
    %112 = arith.addf %72, %111 : vector<8x256xf32>
    %113 = vector.extract_strided_slice %2 {offsets = [0, 20], sizes = [8, 1], strides = [1, 1]} : vector<8x27xf32> to vector<8x1xf32>
    %114 = vector.extract_strided_slice %82 {offsets = [5, 0], sizes = [1, 256], strides = [1, 1]} : vector<6x256xf32> to vector<1x256xf32>
    %115 = vector.broadcast %113 : vector<8x1xf32> to vector<8x256xf32>
    %116 = vector.broadcast %114 : vector<1x256xf32> to vector<8x256xf32>
    %117 = arith.mulf %115, %116 : vector<8x256xf32>
    %118 = arith.addf %78, %117 : vector<8x256xf32>
    %c1_i32 = arith.constant 1 : i32
    %119 = tpu.dynamic_rotate %1 by %c1_i32 dim 1 : vector<6x256xf32>, i32 -> vector<6x256xf32>
    %120 = vector.extract_strided_slice %4 {offsets = [3, 0], sizes = [1, 256], strides = [1, 1]} : vector<9x256xf32> to vector<1x256xf32>
    %121 = vector.broadcast %120 : vector<1x256xf32> to vector<6x256xf32>
    %122 = arith.mulf %119, %121 : vector<6x256xf32>
    %123 = vector.extract_strided_slice %2 {offsets = [0, 3], sizes = [8, 1], strides = [1, 1]} : vector<8x27xf32> to vector<8x1xf32>
    %124 = vector.extract_strided_slice %122 {offsets = [0, 0], sizes = [1, 256], strides = [1, 1]} : vector<6x256xf32> to vector<1x256xf32>
    %125 = vector.broadcast %123 : vector<8x1xf32> to vector<8x256xf32>
    %126 = vector.broadcast %124 : vector<1x256xf32> to vector<8x256xf32>
    %127 = arith.mulf %125, %126 : vector<8x256xf32>
    %128 = arith.addf %88, %127 : vector<8x256xf32>
    %129 = vector.extract_strided_slice %2 {offsets = [0, 12], sizes = [8, 1], strides = [1, 1]} : vector<8x27xf32> to vector<8x1xf32>
    %130 = vector.extract_strided_slice %122 {offsets = [1, 0], sizes = [1, 256], strides = [1, 1]} : vector<6x256xf32> to vector<1x256xf32>
    %131 = vector.broadcast %129 : vector<8x1xf32> to vector<8x256xf32>
    %132 = vector.broadcast %130 : vector<1x256xf32> to vector<8x256xf32>
    %133 = arith.mulf %131, %132 : vector<8x256xf32>
    %134 = arith.addf %94, %133 : vector<8x256xf32>
    %135 = vector.extract_strided_slice %2 {offsets = [0, 21], sizes = [8, 1], strides = [1, 1]} : vector<8x27xf32> to vector<8x1xf32>
    %136 = vector.extract_strided_slice %122 {offsets = [2, 0], sizes = [1, 256], strides = [1, 1]} : vector<6x256xf32> to vector<1x256xf32>
    %137 = vector.broadcast %135 : vector<8x1xf32> to vector<8x256xf32>
    %138 = vector.broadcast %136 : vector<1x256xf32> to vector<8x256xf32>
    %139 = arith.mulf %137, %138 : vector<8x256xf32>
    %140 = arith.addf %100, %139 : vector<8x256xf32>
    %141 = vector.extract_strided_slice %2 {offsets = [0, 3], sizes = [8, 1], strides = [1, 1]} : vector<8x27xf32> to vector<8x1xf32>
    %142 = vector.extract_strided_slice %122 {offsets = [3, 0], sizes = [1, 256], strides = [1, 1]} : vector<6x256xf32> to vector<1x256xf32>
    %143 = vector.broadcast %141 : vector<8x1xf32> to vector<8x256xf32>
    %144 = vector.broadcast %142 : vector<1x256xf32> to vector<8x256xf32>
    %145 = arith.mulf %143, %144 : vector<8x256xf32>
    %146 = arith.addf %106, %145 : vector<8x256xf32>
    %147 = vector.extract_strided_slice %2 {offsets = [0, 12], sizes = [8, 1], strides = [1, 1]} : vector<8x27xf32> to vector<8x1xf32>
    %148 = vector.extract_strided_slice %122 {offsets = [4, 0], sizes = [1, 256], strides = [1, 1]} : vector<6x256xf32> to vector<1x256xf32>
    %149 = vector.broadcast %147 : vector<8x1xf32> to vector<8x256xf32>
    %150 = vector.broadcast %148 : vector<1x256xf32> to vector<8x256xf32>
    %151 = arith.mulf %149, %150 : vector<8x256xf32>
    %152 = arith.addf %112, %151 : vector<8x256xf32>
    %153 = vector.extract_strided_slice %2 {offsets = [0, 21], sizes = [8, 1], strides = [1, 1]} : vector<8x27xf32> to vector<8x1xf32>
    %154 = vector.extract_strided_slice %122 {offsets = [5, 0], sizes = [1, 256], strides = [1, 1]} : vector<6x256xf32> to vector<1x256xf32>
    %155 = vector.broadcast %153 : vector<8x1xf32> to vector<8x256xf32>
    %156 = vector.broadcast %154 : vector<1x256xf32> to vector<8x256xf32>
    %157 = arith.mulf %155, %156 : vector<8x256xf32>
    %158 = arith.addf %118, %157 : vector<8x256xf32>
    %159 = vector.extract_strided_slice %2 {offsets = [0, 4], sizes = [8, 1], strides = [1, 1]} : vector<8x27xf32> to vector<8x1xf32>
    %160 = vector.extract_strided_slice %1 {offsets = [0, 0], sizes = [1, 256], strides = [1, 1]} : vector<6x256xf32> to vector<1x256xf32>
    %161 = vector.broadcast %159 : vector<8x1xf32> to vector<8x256xf32>
    %162 = vector.broadcast %160 : vector<1x256xf32> to vector<8x256xf32>
    %163 = arith.mulf %161, %162 : vector<8x256xf32>
    %164 = arith.addf %128, %163 : vector<8x256xf32>
    %165 = vector.extract_strided_slice %2 {offsets = [0, 13], sizes = [8, 1], strides = [1, 1]} : vector<8x27xf32> to vector<8x1xf32>
    %166 = vector.extract_strided_slice %1 {offsets = [1, 0], sizes = [1, 256], strides = [1, 1]} : vector<6x256xf32> to vector<1x256xf32>
    %167 = vector.broadcast %165 : vector<8x1xf32> to vector<8x256xf32>
    %168 = vector.broadcast %166 : vector<1x256xf32> to vector<8x256xf32>
    %169 = arith.mulf %167, %168 : vector<8x256xf32>
    %170 = arith.addf %134, %169 : vector<8x256xf32>
    %171 = vector.extract_strided_slice %2 {offsets = [0, 22], sizes = [8, 1], strides = [1, 1]} : vector<8x27xf32> to vector<8x1xf32>
    %172 = vector.extract_strided_slice %1 {offsets = [2, 0], sizes = [1, 256], strides = [1, 1]} : vector<6x256xf32> to vector<1x256xf32>
    %173 = vector.broadcast %171 : vector<8x1xf32> to vector<8x256xf32>
    %174 = vector.broadcast %172 : vector<1x256xf32> to vector<8x256xf32>
    %175 = arith.mulf %173, %174 : vector<8x256xf32>
    %176 = arith.addf %140, %175 : vector<8x256xf32>
    %177 = vector.extract_strided_slice %2 {offsets = [0, 4], sizes = [8, 1], strides = [1, 1]} : vector<8x27xf32> to vector<8x1xf32>
    %178 = vector.extract_strided_slice %1 {offsets = [3, 0], sizes = [1, 256], strides = [1, 1]} : vector<6x256xf32> to vector<1x256xf32>
    %179 = vector.broadcast %177 : vector<8x1xf32> to vector<8x256xf32>
    %180 = vector.broadcast %178 : vector<1x256xf32> to vector<8x256xf32>
    %181 = arith.mulf %179, %180 : vector<8x256xf32>
    %182 = arith.addf %146, %181 : vector<8x256xf32>
    %183 = vector.extract_strided_slice %2 {offsets = [0, 13], sizes = [8, 1], strides = [1, 1]} : vector<8x27xf32> to vector<8x1xf32>
    %184 = vector.extract_strided_slice %1 {offsets = [4, 0], sizes = [1, 256], strides = [1, 1]} : vector<6x256xf32> to vector<1x256xf32>
    %185 = vector.broadcast %183 : vector<8x1xf32> to vector<8x256xf32>
    %186 = vector.broadcast %184 : vector<1x256xf32> to vector<8x256xf32>
    %187 = arith.mulf %185, %186 : vector<8x256xf32>
    %188 = arith.addf %152, %187 : vector<8x256xf32>
    %189 = vector.extract_strided_slice %2 {offsets = [0, 22], sizes = [8, 1], strides = [1, 1]} : vector<8x27xf32> to vector<8x1xf32>
    %190 = vector.extract_strided_slice %1 {offsets = [5, 0], sizes = [1, 256], strides = [1, 1]} : vector<6x256xf32> to vector<1x256xf32>
    %191 = vector.broadcast %189 : vector<8x1xf32> to vector<8x256xf32>
    %192 = vector.broadcast %190 : vector<1x256xf32> to vector<8x256xf32>
    %193 = arith.mulf %191, %192 : vector<8x256xf32>
    %194 = arith.addf %158, %193 : vector<8x256xf32>
    %c255_i32 = arith.constant 255 : i32
    %195 = tpu.dynamic_rotate %1 by %c255_i32 dim 1 : vector<6x256xf32>, i32 -> vector<6x256xf32>
    %196 = vector.extract_strided_slice %4 {offsets = [5, 0], sizes = [1, 256], strides = [1, 1]} : vector<9x256xf32> to vector<1x256xf32>
    %197 = vector.broadcast %196 : vector<1x256xf32> to vector<6x256xf32>
    %198 = arith.mulf %195, %197 : vector<6x256xf32>
    %199 = vector.extract_strided_slice %2 {offsets = [0, 5], sizes = [8, 1], strides = [1, 1]} : vector<8x27xf32> to vector<8x1xf32>
    %200 = vector.extract_strided_slice %198 {offsets = [0, 0], sizes = [1, 256], strides = [1, 1]} : vector<6x256xf32> to vector<1x256xf32>
    %201 = vector.broadcast %199 : vector<8x1xf32> to vector<8x256xf32>
    %202 = vector.broadcast %200 : vector<1x256xf32> to vector<8x256xf32>
    %203 = arith.mulf %201, %202 : vector<8x256xf32>
    %204 = arith.addf %164, %203 : vector<8x256xf32>
    %205 = vector.extract_strided_slice %2 {offsets = [0, 14], sizes = [8, 1], strides = [1, 1]} : vector<8x27xf32> to vector<8x1xf32>
    %206 = vector.extract_strided_slice %198 {offsets = [1, 0], sizes = [1, 256], strides = [1, 1]} : vector<6x256xf32> to vector<1x256xf32>
    %207 = vector.broadcast %205 : vector<8x1xf32> to vector<8x256xf32>
    %208 = vector.broadcast %206 : vector<1x256xf32> to vector<8x256xf32>
    %209 = arith.mulf %207, %208 : vector<8x256xf32>
    %210 = arith.addf %170, %209 : vector<8x256xf32>
    %211 = vector.extract_strided_slice %2 {offsets = [0, 23], sizes = [8, 1], strides = [1, 1]} : vector<8x27xf32> to vector<8x1xf32>
    %212 = vector.extract_strided_slice %198 {offsets = [2, 0], sizes = [1, 256], strides = [1, 1]} : vector<6x256xf32> to vector<1x256xf32>
    %213 = vector.broadcast %211 : vector<8x1xf32> to vector<8x256xf32>
    %214 = vector.broadcast %212 : vector<1x256xf32> to vector<8x256xf32>
    %215 = arith.mulf %213, %214 : vector<8x256xf32>
    %216 = arith.addf %176, %215 : vector<8x256xf32>
    %217 = vector.extract_strided_slice %2 {offsets = [0, 5], sizes = [8, 1], strides = [1, 1]} : vector<8x27xf32> to vector<8x1xf32>
    %218 = vector.extract_strided_slice %198 {offsets = [3, 0], sizes = [1, 256], strides = [1, 1]} : vector<6x256xf32> to vector<1x256xf32>
    %219 = vector.broadcast %217 : vector<8x1xf32> to vector<8x256xf32>
    %220 = vector.broadcast %218 : vector<1x256xf32> to vector<8x256xf32>
    %221 = arith.mulf %219, %220 : vector<8x256xf32>
    %222 = arith.addf %182, %221 : vector<8x256xf32>
    %223 = vector.extract_strided_slice %2 {offsets = [0, 14], sizes = [8, 1], strides = [1, 1]} : vector<8x27xf32> to vector<8x1xf32>
    %224 = vector.extract_strided_slice %198 {offsets = [4, 0], sizes = [1, 256], strides = [1, 1]} : vector<6x256xf32> to vector<1x256xf32>
    %225 = vector.broadcast %223 : vector<8x1xf32> to vector<8x256xf32>
    %226 = vector.broadcast %224 : vector<1x256xf32> to vector<8x256xf32>
    %227 = arith.mulf %225, %226 : vector<8x256xf32>
    %228 = arith.addf %188, %227 : vector<8x256xf32>
    %229 = vector.extract_strided_slice %2 {offsets = [0, 23], sizes = [8, 1], strides = [1, 1]} : vector<8x27xf32> to vector<8x1xf32>
    %230 = vector.extract_strided_slice %198 {offsets = [5, 0], sizes = [1, 256], strides = [1, 1]} : vector<6x256xf32> to vector<1x256xf32>
    %231 = vector.broadcast %229 : vector<8x1xf32> to vector<8x256xf32>
    %232 = vector.broadcast %230 : vector<1x256xf32> to vector<8x256xf32>
    %233 = arith.mulf %231, %232 : vector<8x256xf32>
    %234 = arith.addf %194, %233 : vector<8x256xf32>
    %c241_i32 = arith.constant 241 : i32
    %235 = tpu.dynamic_rotate %1 by %c241_i32 dim 1 : vector<6x256xf32>, i32 -> vector<6x256xf32>
    %236 = vector.extract_strided_slice %4 {offsets = [6, 0], sizes = [1, 256], strides = [1, 1]} : vector<9x256xf32> to vector<1x256xf32>
    %237 = vector.broadcast %236 : vector<1x256xf32> to vector<6x256xf32>
    %238 = arith.mulf %235, %237 : vector<6x256xf32>
    %239 = vector.extract_strided_slice %2 {offsets = [0, 6], sizes = [8, 1], strides = [1, 1]} : vector<8x27xf32> to vector<8x1xf32>
    %240 = vector.extract_strided_slice %238 {offsets = [0, 0], sizes = [1, 256], strides = [1, 1]} : vector<6x256xf32> to vector<1x256xf32>
    %241 = vector.broadcast %239 : vector<8x1xf32> to vector<8x256xf32>
    %242 = vector.broadcast %240 : vector<1x256xf32> to vector<8x256xf32>
    %243 = arith.mulf %241, %242 : vector<8x256xf32>
    %244 = arith.addf %204, %243 : vector<8x256xf32>
    %245 = vector.extract_strided_slice %2 {offsets = [0, 15], sizes = [8, 1], strides = [1, 1]} : vector<8x27xf32> to vector<8x1xf32>
    %246 = vector.extract_strided_slice %238 {offsets = [1, 0], sizes = [1, 256], strides = [1, 1]} : vector<6x256xf32> to vector<1x256xf32>
    %247 = vector.broadcast %245 : vector<8x1xf32> to vector<8x256xf32>
    %248 = vector.broadcast %246 : vector<1x256xf32> to vector<8x256xf32>
    %249 = arith.mulf %247, %248 : vector<8x256xf32>
    %250 = arith.addf %210, %249 : vector<8x256xf32>
    %251 = vector.extract_strided_slice %2 {offsets = [0, 24], sizes = [8, 1], strides = [1, 1]} : vector<8x27xf32> to vector<8x1xf32>
    %252 = vector.extract_strided_slice %238 {offsets = [2, 0], sizes = [1, 256], strides = [1, 1]} : vector<6x256xf32> to vector<1x256xf32>
    %253 = vector.broadcast %251 : vector<8x1xf32> to vector<8x256xf32>
    %254 = vector.broadcast %252 : vector<1x256xf32> to vector<8x256xf32>
    %255 = arith.mulf %253, %254 : vector<8x256xf32>
    %256 = arith.addf %216, %255 : vector<8x256xf32>
    %257 = vector.extract_strided_slice %2 {offsets = [0, 6], sizes = [8, 1], strides = [1, 1]} : vector<8x27xf32> to vector<8x1xf32>
    %258 = vector.extract_strided_slice %238 {offsets = [3, 0], sizes = [1, 256], strides = [1, 1]} : vector<6x256xf32> to vector<1x256xf32>
    %259 = vector.broadcast %257 : vector<8x1xf32> to vector<8x256xf32>
    %260 = vector.broadcast %258 : vector<1x256xf32> to vector<8x256xf32>
    %261 = arith.mulf %259, %260 : vector<8x256xf32>
    %262 = arith.addf %222, %261 : vector<8x256xf32>
    %263 = vector.extract_strided_slice %2 {offsets = [0, 15], sizes = [8, 1], strides = [1, 1]} : vector<8x27xf32> to vector<8x1xf32>
    %264 = vector.extract_strided_slice %238 {offsets = [4, 0], sizes = [1, 256], strides = [1, 1]} : vector<6x256xf32> to vector<1x256xf32>
    %265 = vector.broadcast %263 : vector<8x1xf32> to vector<8x256xf32>
    %266 = vector.broadcast %264 : vector<1x256xf32> to vector<8x256xf32>
    %267 = arith.mulf %265, %266 : vector<8x256xf32>
    %268 = arith.addf %228, %267 : vector<8x256xf32>
    %269 = vector.extract_strided_slice %2 {offsets = [0, 24], sizes = [8, 1], strides = [1, 1]} : vector<8x27xf32> to vector<8x1xf32>
    %270 = vector.extract_strided_slice %238 {offsets = [5, 0], sizes = [1, 256], strides = [1, 1]} : vector<6x256xf32> to vector<1x256xf32>
    %271 = vector.broadcast %269 : vector<8x1xf32> to vector<8x256xf32>
    %272 = vector.broadcast %270 : vector<1x256xf32> to vector<8x256xf32>
    %273 = arith.mulf %271, %272 : vector<8x256xf32>
    %274 = arith.addf %234, %273 : vector<8x256xf32>
    %c240_i32 = arith.constant 240 : i32
    %275 = tpu.dynamic_rotate %1 by %c240_i32 dim 1 : vector<6x256xf32>, i32 -> vector<6x256xf32>
    %276 = vector.extract_strided_slice %4 {offsets = [7, 0], sizes = [1, 256], strides = [1, 1]} : vector<9x256xf32> to vector<1x256xf32>
    %277 = vector.broadcast %276 : vector<1x256xf32> to vector<6x256xf32>
    %278 = arith.mulf %275, %277 : vector<6x256xf32>
    %279 = vector.extract_strided_slice %2 {offsets = [0, 7], sizes = [8, 1], strides = [1, 1]} : vector<8x27xf32> to vector<8x1xf32>
    %280 = vector.extract_strided_slice %278 {offsets = [0, 0], sizes = [1, 256], strides = [1, 1]} : vector<6x256xf32> to vector<1x256xf32>
    %281 = vector.broadcast %279 : vector<8x1xf32> to vector<8x256xf32>
    %282 = vector.broadcast %280 : vector<1x256xf32> to vector<8x256xf32>
    %283 = arith.mulf %281, %282 : vector<8x256xf32>
    %284 = arith.addf %244, %283 : vector<8x256xf32>
    %285 = vector.extract_strided_slice %2 {offsets = [0, 16], sizes = [8, 1], strides = [1, 1]} : vector<8x27xf32> to vector<8x1xf32>
    %286 = vector.extract_strided_slice %278 {offsets = [1, 0], sizes = [1, 256], strides = [1, 1]} : vector<6x256xf32> to vector<1x256xf32>
    %287 = vector.broadcast %285 : vector<8x1xf32> to vector<8x256xf32>
    %288 = vector.broadcast %286 : vector<1x256xf32> to vector<8x256xf32>
    %289 = arith.mulf %287, %288 : vector<8x256xf32>
    %290 = arith.addf %250, %289 : vector<8x256xf32>
    %291 = vector.extract_strided_slice %2 {offsets = [0, 25], sizes = [8, 1], strides = [1, 1]} : vector<8x27xf32> to vector<8x1xf32>
    %292 = vector.extract_strided_slice %278 {offsets = [2, 0], sizes = [1, 256], strides = [1, 1]} : vector<6x256xf32> to vector<1x256xf32>
    %293 = vector.broadcast %291 : vector<8x1xf32> to vector<8x256xf32>
    %294 = vector.broadcast %292 : vector<1x256xf32> to vector<8x256xf32>
    %295 = arith.mulf %293, %294 : vector<8x256xf32>
    %296 = arith.addf %256, %295 : vector<8x256xf32>
    %297 = vector.extract_strided_slice %2 {offsets = [0, 7], sizes = [8, 1], strides = [1, 1]} : vector<8x27xf32> to vector<8x1xf32>
    %298 = vector.extract_strided_slice %278 {offsets = [3, 0], sizes = [1, 256], strides = [1, 1]} : vector<6x256xf32> to vector<1x256xf32>
    %299 = vector.broadcast %297 : vector<8x1xf32> to vector<8x256xf32>
    %300 = vector.broadcast %298 : vector<1x256xf32> to vector<8x256xf32>
    %301 = arith.mulf %299, %300 : vector<8x256xf32>
    %302 = arith.addf %262, %301 : vector<8x256xf32>
    %303 = vector.extract_strided_slice %2 {offsets = [0, 16], sizes = [8, 1], strides = [1, 1]} : vector<8x27xf32> to vector<8x1xf32>
    %304 = vector.extract_strided_slice %278 {offsets = [4, 0], sizes = [1, 256], strides = [1, 1]} : vector<6x256xf32> to vector<1x256xf32>
    %305 = vector.broadcast %303 : vector<8x1xf32> to vector<8x256xf32>
    %306 = vector.broadcast %304 : vector<1x256xf32> to vector<8x256xf32>
    %307 = arith.mulf %305, %306 : vector<8x256xf32>
    %308 = arith.addf %268, %307 : vector<8x256xf32>
    %309 = vector.extract_strided_slice %2 {offsets = [0, 25], sizes = [8, 1], strides = [1, 1]} : vector<8x27xf32> to vector<8x1xf32>
    %310 = vector.extract_strided_slice %278 {offsets = [5, 0], sizes = [1, 256], strides = [1, 1]} : vector<6x256xf32> to vector<1x256xf32>
    %311 = vector.broadcast %309 : vector<8x1xf32> to vector<8x256xf32>
    %312 = vector.broadcast %310 : vector<1x256xf32> to vector<8x256xf32>
    %313 = arith.mulf %311, %312 : vector<8x256xf32>
    %314 = arith.addf %274, %313 : vector<8x256xf32>
    %c239_i32 = arith.constant 239 : i32
    %315 = tpu.dynamic_rotate %1 by %c239_i32 dim 1 : vector<6x256xf32>, i32 -> vector<6x256xf32>
    %316 = vector.extract_strided_slice %4 {offsets = [8, 0], sizes = [1, 256], strides = [1, 1]} : vector<9x256xf32> to vector<1x256xf32>
    %317 = vector.broadcast %316 : vector<1x256xf32> to vector<6x256xf32>
    %318 = arith.mulf %315, %317 : vector<6x256xf32>
    %319 = vector.extract_strided_slice %2 {offsets = [0, 8], sizes = [8, 1], strides = [1, 1]} : vector<8x27xf32> to vector<8x1xf32>
    %320 = vector.extract_strided_slice %318 {offsets = [0, 0], sizes = [1, 256], strides = [1, 1]} : vector<6x256xf32> to vector<1x256xf32>
    %321 = vector.broadcast %319 : vector<8x1xf32> to vector<8x256xf32>
    %322 = vector.broadcast %320 : vector<1x256xf32> to vector<8x256xf32>
    %323 = arith.mulf %321, %322 : vector<8x256xf32>
    %324 = arith.addf %284, %323 : vector<8x256xf32>
    %325 = vector.extract_strided_slice %2 {offsets = [0, 17], sizes = [8, 1], strides = [1, 1]} : vector<8x27xf32> to vector<8x1xf32>
    %326 = vector.extract_strided_slice %318 {offsets = [1, 0], sizes = [1, 256], strides = [1, 1]} : vector<6x256xf32> to vector<1x256xf32>
    %327 = vector.broadcast %325 : vector<8x1xf32> to vector<8x256xf32>
    %328 = vector.broadcast %326 : vector<1x256xf32> to vector<8x256xf32>
    %329 = arith.mulf %327, %328 : vector<8x256xf32>
    %330 = arith.addf %290, %329 : vector<8x256xf32>
    %331 = vector.extract_strided_slice %2 {offsets = [0, 26], sizes = [8, 1], strides = [1, 1]} : vector<8x27xf32> to vector<8x1xf32>
    %332 = vector.extract_strided_slice %318 {offsets = [2, 0], sizes = [1, 256], strides = [1, 1]} : vector<6x256xf32> to vector<1x256xf32>
    %333 = vector.broadcast %331 : vector<8x1xf32> to vector<8x256xf32>
    %334 = vector.broadcast %332 : vector<1x256xf32> to vector<8x256xf32>
    %335 = arith.mulf %333, %334 : vector<8x256xf32>
    %336 = arith.addf %296, %335 : vector<8x256xf32>
    %337 = vector.extract_strided_slice %2 {offsets = [0, 8], sizes = [8, 1], strides = [1, 1]} : vector<8x27xf32> to vector<8x1xf32>
    %338 = vector.extract_strided_slice %318 {offsets = [3, 0], sizes = [1, 256], strides = [1, 1]} : vector<6x256xf32> to vector<1x256xf32>
    %339 = vector.broadcast %337 : vector<8x1xf32> to vector<8x256xf32>
    %340 = vector.broadcast %338 : vector<1x256xf32> to vector<8x256xf32>
    %341 = arith.mulf %339, %340 : vector<8x256xf32>
    %342 = arith.addf %302, %341 : vector<8x256xf32>
    %343 = vector.extract_strided_slice %2 {offsets = [0, 17], sizes = [8, 1], strides = [1, 1]} : vector<8x27xf32> to vector<8x1xf32>
    %344 = vector.extract_strided_slice %318 {offsets = [4, 0], sizes = [1, 256], strides = [1, 1]} : vector<6x256xf32> to vector<1x256xf32>
    %345 = vector.broadcast %343 : vector<8x1xf32> to vector<8x256xf32>
    %346 = vector.broadcast %344 : vector<1x256xf32> to vector<8x256xf32>
    %347 = arith.mulf %345, %346 : vector<8x256xf32>
    %348 = arith.addf %308, %347 : vector<8x256xf32>
    %349 = vector.extract_strided_slice %2 {offsets = [0, 26], sizes = [8, 1], strides = [1, 1]} : vector<8x27xf32> to vector<8x1xf32>
    %350 = vector.extract_strided_slice %318 {offsets = [5, 0], sizes = [1, 256], strides = [1, 1]} : vector<6x256xf32> to vector<1x256xf32>
    %351 = vector.broadcast %349 : vector<8x1xf32> to vector<8x256xf32>
    %352 = vector.broadcast %350 : vector<1x256xf32> to vector<8x256xf32>
    %353 = arith.mulf %351, %352 : vector<8x256xf32>
    %354 = arith.addf %314, %353 : vector<8x256xf32>
    %355 = arith.addf %324, %330 : vector<8x256xf32>
    %356 = arith.addf %355, %336 : vector<8x256xf32>
    %357 = vector.broadcast %3 : vector<8x1xf32> to vector<8x256xf32>
    %358 = arith.addf %356, %357 : vector<8x256xf32>
    %c0_8 = arith.constant 0 : index
    %c0_9 = arith.constant 0 : index
    %c0_10 = arith.constant 0 : index
    %359 = vector.load %arg5[%c0_8, %c0_9, %c0_10] : memref<1x16x256xf32, #tpu.memory_space<vmem>>, vector<1x8x256xf32>
    %360 = vector.shape_cast %359 : vector<1x8x256xf32> to vector<8x256xf32>
    %361 = arith.subf %360, %358 : vector<8x256xf32>
    %c0_11 = arith.constant 0 : index
    %c0_12 = arith.constant 0 : index
    %c0_13 = arith.constant 0 : index
    %362 = vector.load %arg6[%c0_11, %c0_12, %c0_13] : memref<1x16x256xf32, #tpu.memory_space<vmem>>, vector<1x8x256xf32>
    %363 = vector.shape_cast %362 : vector<1x8x256xf32> to vector<8x256xf32>
    %364 = vector.shape_cast %361 : vector<8x256xf32> to vector<1x8x256xf32>
    tpu.vector_store %arg6[%c0_11, %c0_12, %c0_13], %364 {strides = array<i32>} : memref<1x16x256xf32, #tpu.memory_space<vmem>>, vector<1x8x256xf32>,
    %365 = arith.addf %342, %348 : vector<8x256xf32>
    %366 = arith.addf %365, %354 : vector<8x256xf32>
    %367 = vector.broadcast %3 : vector<8x1xf32> to vector<8x256xf32>
    %368 = arith.addf %366, %367 : vector<8x256xf32>
    %c0_14 = arith.constant 0 : index
    %c8 = arith.constant 8 : index
    %c0_15 = arith.constant 0 : index
    %369 = vector.load %arg5[%c0_14, %c8, %c0_15] : memref<1x16x256xf32, #tpu.memory_space<vmem>>, vector<1x8x256xf32>
    %370 = vector.shape_cast %369 : vector<1x8x256xf32> to vector<8x256xf32>
    %371 = arith.subf %370, %368 : vector<8x256xf32>
    %c0_16 = arith.constant 0 : index
    %c8_17 = arith.constant 8 : index
    %c0_18 = arith.constant 0 : index
    %372 = vector.load %arg6[%c0_16, %c8_17, %c0_18] : memref<1x16x256xf32, #tpu.memory_space<vmem>>, vector<1x8x256xf32>
    %373 = vector.shape_cast %372 : vector<1x8x256xf32> to vector<8x256xf32>
    %374 = vector.shape_cast %371 : vector<8x256xf32> to vector<1x8x256xf32>
    tpu.vector_store %arg6[%c0_16, %c8_17, %c0_18], %374 {strides = array<i32>} : memref<1x16x256xf32, #tpu.memory_space<vmem>>, vector<1x8x256xf32>,
    return
  }
  func.func @transform_0(%arg0: i32) -> (i32, i32) {
    %c0_i32 = arith.constant 0 : i32
    %c0_i32_0 = arith.constant 0 : i32
    %c0_i32_1 = arith.constant 0 : i32
    return %c0_i32, %c0_i32_0 : i32, i32
  }
  func.func @transform_1(%arg0: i32) -> (i32, i32) {
    %c0_i32 = arith.constant 0 : i32
    %c0_i32_0 = arith.constant 0 : i32
    %c0_i32_1 = arith.constant 0 : i32
    return %c0_i32, %c0_i32_0 : i32, i32
  }
  func.func @transform_2(%arg0: i32) -> (i32, i32) {
    %c0_i32 = arith.constant 0 : i32
    %c0_i32_0 = arith.constant 0 : i32
    %c0_i32_1 = arith.constant 0 : i32
    return %c0_i32, %c0_i32_0 : i32, i32
  }
  func.func @transform_3(%arg0: i32) -> (i32, i32, i32) {
    %c0_i32 = arith.constant 0 : i32
    %c0_i32_0 = arith.constant 0 : i32
    %c0_i32_1 = arith.constant 0 : i32
    return %arg0, %c0_i32, %c0_i32_0 : i32, i32, i32
  }
  func.func @transform_4(%arg0: i32) -> (i32, i32, i32) {
    %c0_i32 = arith.constant 0 : i32
    %c0_i32_0 = arith.constant 0 : i32
    %c0_i32_1 = arith.constant 0 : i32
    return %arg0, %c0_i32, %c0_i32_0 : i32, i32, i32
  }
  func.func @transform_5(%arg0: i32) -> (i32, i32, i32) {
    %c0_i32 = arith.constant 0 : i32
    %c0_i32_0 = arith.constant 0 : i32
    %c0_i32_1 = arith.constant 0 : i32
    return %arg0, %c0_i32, %c0_i32_0 : i32, i32, i32
  }
}

</mosaic_0001>

<bundles_post_ra>
// kernel: tpu_custom_call.1
= control target key start
LH: loop header
LB: loop body
LE: loop exit
PB: predicated region body
PF: predicated region fallthrough
CT: control target
= control target key end

     0   :  { %10 = vsyncpa [#allocation3], 0  ;;  %s1656_s0 = inlined_call_operand.vmem [shape: f32[8,27], index: 0, kind: input, shape index: {}]   ;;  %s1657_s1 = inlined_call_operand.vmem [shape: f32[8,1], index: 1, kind: input, shape index: {}]   ;;  %s1658_s2 = inlined_call_operand.vmem [shape: f32[9,256], index: 2, kind: input, shape index: {}]   ;;  %s1659_s3 = inlined_call_operand.vmem [shape: f32[1,6,256], index: 3, kind: input, shape index: {}]   ;;  %s1660_s4 = inlined_call_operand.hbm [shape: f32[1,16,256], index: 4, kind: input, shape index: {}]   ;;  %s1661_s5 = inlined_call_operand.hbm [shape: f32[1,16,256], index: 5, kind: output, shape index: {}]  }
   0x1   :  { %11 = vsyncpa [#allocation4], 0  ;;  %s1084_s18 = smov [#allocation2]  }
   0x2   :  { %s25_s19 = sshll.u32 %s1084_s18, 4  ;;  %s26_s19 = int_to_ptr.vmem [resolvable:$true] %s25_s19 }
   0x3   :  { %s1048_s20 = scalar_lea.vmem %s26_s19, 512  ;;  %p1053_p1 = scmp.lt.s32.totalorder %s26_s19, %s26_s19 }
   0x4   :  { %p1049_p0 = scmp.ne.s32.totalorder %s26_s19, %s1048_s20  ;;  %p1054_p2 = scmp.lt.s32.totalorder %s1048_s20, %s1048_s20 }
   0x6   :  { %p1055_p3 = por %p1054_p2, %p1053_p1 }
   0x8   :  { %p1056_p4 = pnand %p1055_p3, %p1049_p0 }
   0xa   :  { %1059 = shalt.err (!%p1056_p4)
}
   0xb   :  { %s1085_s21 = smov 256   ;;  %s1086_s22 = smov 16  }
   0xc   :  { %31 = dma.hbm_to_vmem [thread:$0]  %s1660_s4, 512, %s26_s19, [#allocation3], %s1085_s21, %s1085_s21, %s1086_s22  }
   0xd   :  { %1080 = dma.done.wait [#allocation3], 512  }
   0xe   :  { %1081 = vsyncadd [#allocation3], 4294966784  ;;  %v1087_v0 = vmov 0   ;;  %v1088_v1 = vmov 18   ;;  %v1162_v2 = vld [vmem:[%s1656_s0] sm:$0xff]  ;;  %s1089_s4 = smov 17   ;;  %v47_v31 = vlaneseq }
   0xf   :  { %1012 = vset.pattern.permute.xlu1 %v1087_v0  ;;  %1014 = vset.pattern.permute.xlu0 %v1088_v1  ;;  %v1167_v3 = vld [vmem:[%s1659_s3] sm:$0x3f]  ;;  %v1174_v4 = vld [vmem:[%s1659_s3 + $0x8] sm:$0x3f]  ;;  %v1090_v5 = vmov 9   ;;  %v1091_v6 = vmov 10  }
  0x10   :  { %64 = vperm.xlu1 %1012, %v1162_v2   ;;  %43 = vrot.lane.b32.xlu0 %v1167_v3, %s1089_s4  ;;  %v1092_v7 = vmov 1   ;;  %s1093_s0 = smov 15   ;;  %v1094_v8 = vmov 2   ;;  %v1095_v9 = vmov 19   ;;  %s1096_s3 = smov 1   ;;  %v1097_v10 = vmov 3  }
  0x11   :  { %v1098_v11 = vmov 11   ;;  %v1099_v12 = vmov 4   ;;  %v1100_v13 = vmov 20   ;;  %s1101_s6 = smov 127   ;;  %v1102_v14 = vmov 5   ;;  %s1104_s7 = smov 113  }
  0x12   :  { %v1103_v15 = vmov 12   ;;  %v1105_v16 = vmov 21   ;;  %v1106_v17 = vmov 6   ;;  %v1107_v18 = vmov 13   ;;  %s1108_s8 = smov 112   ;;  %s1111_s9 = smov 111  }
  0x13   :  { %v1109_v19 = vmov 7   ;;  %v1110_v20 = vmov 22   ;;  %v1112_v21 = vmov 14   ;;  %v1113_v22 = vmov 8   ;;  %v38_v23 = vld [vmem:[%s1657_s1] sm:$0xff]  ;;  %v1240_v37 = vld [vmem:[%s1658_s2 + $0x8] sm:$0xff] }
  0x14   :  { %1013 = vset.pattern.permute.xlu1 %v1090_v5  ;;  %45 = vrot.lane.b32.xlu0 %v1174_v4, %s1089_s4  ;;  %v1114_v24 = vmov 23   ;;  %v1115_v25 = vmov 15   ;;  %v1116_v26 = vmov 24   ;;  %v1117_v27 = vmov 16   ;;  %v1235_v36 = vld [vmem:[%s1658_s2] sm:$0xff] }
  0x15   :  { %78 = vperm.xlu1 %1013, %v1162_v2   ;;  %v1118_v28 = vmov 25   ;;  %v1119_v29 = vmov 17   ;;  %v1120_v30 = vmov 26   ;;  %v1225_v33 = vshrl.u32 %v47_v31, 7 }
  0x16   :  { %v1227_v34 = vand.u32 127, %v47_v31 }
  0x17   :  { %v1230_v35 = vsub.s32 0, %v1225_v33  ;;  %v1252_v47 = vsub.s32 3, %v1225_v33  ;;  %v1255_v48 = vsub.s32 1, %v1225_v33  ;;  %v1258_v49 = vsub.s32 4, %v1225_v33 }
  0x18   :  { %92 = vperm.xlu0 %1014, %v1162_v2   ;;  %vm49_vm0 = vcmp.lt.s32.totalorder %v1227_v34, 17  ;;  %vm139_vm1 = vcmp.lt.s32.totalorder %v1227_v34, 16  ;;  %v1284_v62 = vsub.s32 2, %v1225_v33  ;;  %v1287_v63 = vsub.s32 5, %v1225_v33 }
  0x19   :  { %135 = vrot.lane.b32.xlu1 %v1167_v3, %s1086_s22  ;;  %v55_v40 = vrot.slane %v1235_v36, %v1230_v35  ;;  %v59_v41 = vrot.slane %v1240_v37, %v1230_v35  ;;  %v145_v56 = vrot.slane %v1235_v36, %v1255_v48  ;;  %v149_v57 = vrot.slane %v1240_v37, %v1255_v48 }
  0x1a   :  { %1016 = vset.pattern.permute.xlu1 %v1091_v6  ;;  %vm240_vm2 = vcmp.lt.s32.totalorder %v1227_v34, 15  ;;  %vm341_vm3 = vcmp.lt.s32.totalorder %v1227_v34, 1  ;;  %vm526_vm4 = vcmp.lt.s32.totalorder %v1227_v34, 127  ;;  %vm627_vm5 = vcmp.lt.s32.totalorder %v1227_v34, 113 }
  0x1b   :  { %vm728_vm6 = vcmp.lt.s32.totalorder %v1227_v34, 112  ;;  %vm829_vm7 = vcmp.lt.s32.totalorder %v1227_v34, 111 }
  0x1c   :  { %1015 = vset.pattern.permute.xlu0 %v1092_v7 }
  0x1d   :  { %137 = vrot.lane.b32.xlu1 %v1174_v4, %s1086_s22  ;;  %153 = vperm.xlu0 %1015, %v1162_v2  }
  0x21   :  { %169 = vperm.xlu1 %1016, %v1162_v2   ;;  %236 = vrot.lane.b32.xlu0 %v1167_v3, %s1093_s0 }
  0x22   :  { %1018 = vset.pattern.permute.xlu0 %v1094_v8 }
  0x25   :  { %1017 = vset.pattern.permute.xlu1 %v1095_v9  ;;  %254 = vperm.xlu0 %1018, %v1162_v2  }
  0x26   :  { %185 = vperm.xlu1 %1017, %v1162_v2  }
  0x29   :  { %337 = vrot.lane.b32.xlu0 %v1167_v3, %s1096_s3 }
  0x2a   :  { %238 = vrot.lane.b32.xlu1 %v1174_v4, %s1093_s0  ;;  %1021 = vset.pattern.permute.xlu0 %v1097_v10 }
  0x2b   :  { %1019 = vset.pattern.permute.xlu1 %v1098_v11 }
  0x2d   :  { %355 = vperm.xlu0 %1021, %v1162_v2  }
  0x2e   :  { %270 = vperm.xlu1 %1019, %v1162_v2  }
  0x31   :  { %1024 = vset.pattern.permute.xlu0 %v1099_v12 }
  0x32   :  { %1020 = vset.pattern.permute.xlu1 %v1100_v13  ;;  %439 = vperm.xlu0 %1024, %v1162_v2  }
  0x33   :  { %286 = vperm.xlu1 %1020, %v1162_v2  }
  0x36   :  { %522 = vrot.lane.b32.xlu0 %v1167_v3, %s1101_s6 }
  0x37   :  { %339 = vrot.lane.b32.xlu1 %v1174_v4, %s1096_s3  ;;  %1027 = vset.pattern.permute.xlu0 %v1102_v14 }
  0x38   :  { %1022 = vset.pattern.permute.xlu1 %v1103_v15 }
  0x3a   :  { %540 = vperm.xlu0 %1027, %v1162_v2  }
  0x3b   :  { %371 = vperm.xlu1 %1022, %v1162_v2  }
  0x3e   :  { %623 = vrot.lane.b32.xlu0 %v1167_v3, %s1104_s7 }
  0x3f   :  { %1023 = vset.pattern.permute.xlu1 %v1105_v16  ;;  %1030 = vset.pattern.permute.xlu0 %v1106_v17 }
  0x40   :  { %387 = vperm.xlu1 %1023, %v1162_v2  }
  0x42   :  { %641 = vperm.xlu0 %1030, %v1162_v2  }
  0x44   :  { %1025 = vset.pattern.permute.xlu1 %v1107_v18 }
  0x45   :  { %455 = vperm.xlu1 %1025, %v1162_v2  }
  0x46   :  { %724 = vrot.lane.b32.xlu0 %v1167_v3, %s1108_s8 }
  0x47   :  { %1033 = vset.pattern.permute.xlu0 %v1109_v19 }
  0x49   :  { %1026 = vset.pattern.permute.xlu1 %v1110_v20 }
  0x4a   :  { %471 = vperm.xlu1 %1026, %v1162_v2   ;;  %742 = vperm.xlu0 %1033, %v1162_v2  }
  0x4e   :  { %524 = vrot.lane.b32.xlu1 %v1174_v4, %s1101_s6  ;;  %825 = vrot.lane.b32.xlu0 %v1167_v3, %s1111_s9 }
  0x4f   :  { %1028 = vset.pattern.permute.xlu1 %v1112_v21  ;;  %1036 = vset.pattern.permute.xlu0 %v1113_v22 }
  0x52   :  { %556 = vperm.xlu1 %1028, %v1162_v2   ;;  %843 = vperm.xlu0 %1036, %v1162_v2  }
  0x56   :  { %1029 = vset.pattern.permute.xlu1 %v1114_v24  ;;  %1039 = vset.pattern.permute.xlu0 %v1087_v0 }
  0x57   :  { %572 = vperm.xlu1 %1029, %v1162_v2   ;;  %932 = vperm.xlu0 %1039, %v38_v23  }
  0x5b   :  { %625 = vrot.lane.b32.xlu1 %v1174_v4, %s1104_s7 }
  0x5c   :  { %1031 = vset.pattern.permute.xlu1 %v1115_v25 }
  0x5f   :  { %657 = vperm.xlu1 %1031, %v1162_v2  }
  0x63   :  { %1032 = vset.pattern.permute.xlu1 %v1116_v26 }
  0x64   :  { %673 = vperm.xlu1 %1032, %v1162_v2  }
  0x68   :  { %726 = vrot.lane.b32.xlu1 %v1174_v4, %s1108_s8 }
  0x69   :  { %1034 = vset.pattern.permute.xlu1 %v1117_v27 }
  0x6c   :  { %758 = vperm.xlu1 %1034, %v1162_v2  }
  0x70   :  { %1035 = vset.pattern.permute.xlu1 %v1118_v28 }
  0x71   :  { %774 = vperm.xlu1 %1035, %v1162_v2  }
  0x75   :  { %827 = vrot.lane.b32.xlu1 %v1174_v4, %s1111_s9 }
  0x76   :  { %1037 = vset.pattern.permute.xlu1 %v1119_v29 }
  0x79   :  { %859 = vperm.xlu1 %1037, %v1162_v2  }
  0x7d   :  { %1038 = vset.pattern.permute.xlu1 %v1120_v30 }
  0x7e   :  { %875 = vperm.xlu1 %1038, %v1162_v2  }
  0x82   :  { %v44_v32 = vpop.permute.xlu0 %43 }
  0x86   :  { %v46_v38 = vpop.permute.xlu0 %45 }
  0x87   :  { %v50_v42 = vsel %vm49_vm0, %v44_v32, %v46_v38  ;;  %v51_v43 = vsel %vm49_vm0, %v46_v38, %v44_v32 }
  0x88   :  { %v1247_v45 = vmul.f32 %v55_v40, %v51_v43  ;;  %v1249_v46 = vmul.f32 %v59_v41, %v50_v42 }
  0x8a   :  { %v70_v51 = vrot.slane %v1247_v45, %v1230_v35  ;;  %v74_v52 = vrot.slane %v1249_v46, %v1230_v35  ;;  %v108_v54 = vrot.slane %v1247_v45, %v1252_v47  ;;  %v112_v55 = vrot.slane %v1249_v46, %v1252_v47 }
  0x8b   :  { %v65_v39 = vpop.permute.xlu1 %64  ;;  %v84_v58 = vrot.slane %v1247_v45, %v1255_v48  ;;  %v88_v59 = vrot.slane %v1249_v46, %v1255_v48  ;;  %v118_v60 = vrot.slane %v1247_v45, %v1258_v49  ;;  %v122_v61 = vrot.slane %v1249_v46, %v1258_v49 }
  0x8c   :  { %v75_v1 = vmul.f32 %v70_v51, %v65_v39  ;;  %v76_v2 = vmul.f32 %v74_v52, %v65_v39  ;;  %v113_v7 = vmul.f32 %v108_v54, %v65_v39  ;;  %v114_v8 = vmul.f32 %v112_v55, %v65_v39 }
  0x90   :  { %v79_v44 = vpop.permute.xlu1 %78 }
  0x91   :  { %v89_v11 = vmul.f32 %v84_v58, %v79_v44  ;;  %v90_v12 = vmul.f32 %v88_v59, %v79_v44  ;;  %v123_v13 = vmul.f32 %v118_v60, %v79_v44  ;;  %v124_v14 = vmul.f32 %v122_v61, %v79_v44 }
  0x93   :  { %v1265_v53 = vpop.permute.xlu0 %92 }
  0x94   :  { %v136_v50 = vpop.permute.xlu1 %135 }
  0x98   :  { %v138_v0 = vpop.permute.xlu1 %137  ;;  %v154_v15 = vpop.permute.xlu0 %153 }
  0x99   :  { %v140_v5 = vsel %vm139_vm1, %v136_v50, %v138_v0  ;;  %v141_v6 = vsel %vm139_vm1, %v138_v0, %v136_v50 }
  0x9a   :  { %v150_v9 = vmul.f32 %v145_v56, %v141_v6  ;;  %v151_v10 = vmul.f32 %v149_v57, %v140_v5 }
  0x9c   :  { %v175_v16 = vrot.slane %v150_v9, %v1255_v48  ;;  %v179_v17 = vrot.slane %v151_v10, %v1255_v48  ;;  %v215_v18 = vrot.slane %v150_v9, %v1258_v49  ;;  %v219_v19 = vrot.slane %v151_v10, %v1258_v49  ;;  %v170_v20 = vpop.permute.xlu1 %169  ;;  %v1301_v38 = vpop.permute.xlu0 %236 }
  0x9d   :  { %v159_v21 = vrot.slane %v150_v9, %v1230_v35  ;;  %v163_v22 = vrot.slane %v151_v10, %v1230_v35  ;;  %v203_v23 = vrot.slane %v150_v9, %v1252_v47  ;;  %v207_v24 = vrot.slane %v151_v10, %v1252_v47 }
  0x9e   :  { %v180_v25 = vmul.f32 %v175_v16, %v170_v20  ;;  %v181_v26 = vmul.f32 %v179_v17, %v170_v20  ;;  %v220_v27 = vmul.f32 %v215_v18, %v170_v20  ;;  %v221_v28 = vmul.f32 %v219_v19, %v170_v20 }
  0x9f   :  { %v164_v29 = vmul.f32 %v159_v21, %v154_v15  ;;  %v165_v30 = vmul.f32 %v163_v22, %v154_v15  ;;  %v208_v31 = vmul.f32 %v203_v23, %v154_v15  ;;  %v209_v32 = vmul.f32 %v207_v24, %v154_v15 }
  0xa0   :  { %v1303_v39 = vadd.f32 %v180_v25, %v89_v11  ;;  %v1305_v40 = vadd.f32 %v181_v26, %v90_v12  ;;  %v1307_v41 = vadd.f32 %v220_v27, %v123_v13  ;;  %v1309_v42 = vadd.f32 %v221_v28, %v124_v14 }
  0xa1   :  { %v166_v43 = vadd.f32 %v164_v29, %v75_v1  ;;  %v1311_v44 = vadd.f32 %v165_v30, %v76_v2  ;;  %v210_v50 = vadd.f32 %v208_v31, %v113_v7  ;;  %v1313_v51 = vadd.f32 %v209_v32, %v114_v8  ;;  %v186_v52 = vpop.permute.xlu1 %185  ;;  %v1327_v1 = vpop.permute.xlu0 %254 }
  0xa2   :  { %v191_v54 = vrot.slane %v150_v9, %v1284_v62  ;;  %v195_v55 = vrot.slane %v151_v10, %v1284_v62  ;;  %v227_v56 = vrot.slane %v150_v9, %v1287_v63  ;;  %v231_v57 = vrot.slane %v151_v10, %v1287_v63 }
  0xa3   :  { %v246_v2 = vrot.slane %v1235_v36, %v1284_v62  ;;  %v347_v13 = vrot.slane %v1235_v36, %v1252_v47  ;;  %v250_v15 = vrot.slane %v1240_v37, %v1284_v62  ;;  %v445_v19 = vrot.slane %v1167_v3, %v1230_v35 }
  0xa4   :  { %v1319_v58 = vmul.f32 %v191_v54, %v186_v52  ;;  %v1321_v59 = vmul.f32 %v195_v55, %v186_v52  ;;  %v1323_v60 = vmul.f32 %v227_v56, %v186_v52  ;;  %v1325_v61 = vmul.f32 %v231_v57, %v186_v52 }
  0xa5   :  { %v239_v0 = vpop.permute.xlu1 %238  ;;  %v1337_v7 = vpop.permute.xlu0 %337  ;;  %v489_v20 = vrot.slane %v1167_v3, %v1252_v47  ;;  %v351_v21 = vrot.slane %v1240_v37, %v1252_v47  ;;  %v449_v23 = vrot.slane %v1174_v4, %v1230_v35  ;;  %v493_v24 = vrot.slane %v1174_v4, %v1252_v47 }
  0xa6   :  { %v242_v5 = vsel %vm240_vm2, %v239_v0, %v1301_v38  ;;  %v461_v29 = vrot.slane %v1167_v3, %v1255_v48  ;;  %v501_v30 = vrot.slane %v1167_v3, %v1258_v49  ;;  %v128_v28 = vrot.slane %v1247_v45, %v1287_v63 }
  0xa7   :  { %v251_v8 = vmul.f32 %v246_v2, %v242_v5 }
  0xa9   :  { %v1335_v6 = vpop.permute.xlu1 %270  ;;  %v1341_v10 = vpop.permute.xlu0 %355  ;;  %v260_v11 = vrot.slane %v251_v8, %v1230_v35  ;;  %v304_v12 = vrot.slane %v251_v8, %v1252_v47  ;;  %v276_v31 = vrot.slane %v251_v8, %v1255_v48  ;;  %v316_v32 = vrot.slane %v251_v8, %v1258_v49 }
  0xab   :  { %v265_v17 = vmul.f32 %v260_v11, %v1327_v1  ;;  %v309_v18 = vmul.f32 %v304_v12, %v1327_v1 }
  0xad   :  { %v1365_v25 = vpop.permute.xlu0 %439  ;;  %v267_v55 = vadd.f32 %v265_v17, %v166_v43  ;;  %v311_v56 = vadd.f32 %v309_v18, %v210_v50  ;;  %v281_v17 = vmul.f32 %v276_v31, %v1335_v6  ;;  %v321_v18 = vmul.f32 %v316_v32, %v1335_v6 }
  0xae   :  { %v1339_v9 = vpop.permute.xlu1 %286  ;;  %v450_v57 = vmul.f32 %v445_v19, %v1365_v25  ;;  %v494_v2 = vmul.f32 %v489_v20, %v1365_v25  ;;  %v477_v43 = vrot.slane %v1167_v3, %v1284_v62  ;;  %v513_v50 = vrot.slane %v1167_v3, %v1287_v63 }
  0xaf   :  { %v283_v3 = vadd.f32 %v281_v17, %v1303_v39 }
  0xb2   :  { %v340_v14 = vpop.permute.xlu1 %339 }
  0xb3   :  { %v343_v16 = vsel %vm341_vm3, %v340_v14, %v1337_v7 }
  0xb4   :  { %v352_v22 = vmul.f32 %v347_v13, %v343_v16  ;;  %v98_v16 = vrot.slane %v1247_v45, %v1284_v62  ;;  %v292_v45 = vrot.slane %v251_v8, %v1284_v62 }
  0xb6   :  { %v1367_v26 = vpop.permute.xlu1 %371  ;;  %v361_v52 = vrot.slane %v352_v22, %v1230_v35  ;;  %v405_v54 = vrot.slane %v352_v22, %v1252_v47  ;;  %v377_v12 = vrot.slane %v352_v22, %v1255_v48  ;;  %v417_v13 = vrot.slane %v352_v22, %v1258_v49 }
  0xb8   :  { %v366_v5 = vmul.f32 %v361_v52, %v1341_v10  ;;  %v410_v11 = vmul.f32 %v405_v54, %v1341_v10  ;;  %v241_v54 = vsel %vm240_vm2, %v1301_v38, %v239_v0  ;;  %v382_v31 = vmul.f32 %v377_v12, %v1367_v26 }
  0xb9   :  { %v422_v32 = vmul.f32 %v417_v13, %v1367_v26  ;;  %v133_v38 = vmul.f32 %v128_v28, %v1265_v53  ;;  %v328_v0 = vrot.slane %v251_v8, %v1287_v63  ;;  %v1417_v27 = vmul.f32 %v250_v15, %v241_v54 }
  0xba   :  { %v368_v19 = vadd.f32 %v366_v5, %v267_v55  ;;  %v412_v20 = vadd.f32 %v410_v11, %v311_v56  ;;  %v103_v5 = vmul.f32 %v98_v16, %v1265_v53  ;;  %v632_v11 = vsub.s32 6, %v1225_v33 }
  0xbb   :  { %v1397_v52 = vpop.permute.xlu1 %387  ;;  %v323_v12 = vadd.f32 %v321_v18, %v1307_v41  ;;  %v297_v13 = vmul.f32 %v292_v45, %v1339_v9  ;;  %v393_v28 = vrot.slane %v352_v22, %v1284_v62  ;;  %v429_v8 = vrot.slane %v352_v22, %v1287_v63 }
  0xbc   :  { %v1409_v55 = vadd.f32 %v450_v57, %v368_v19  ;;  %v1411_v56 = vadd.f32 %v494_v2, %v412_v20  ;;  %v333_v57 = vmul.f32 %v328_v0, %v1339_v9  ;;  %v342_v2 = vsel %vm341_vm3, %v1337_v7, %v340_v14 }
  0xbd   :  { %v384_v15 = vadd.f32 %v382_v31, %v283_v3  ;;  %v424_v19 = vadd.f32 %v422_v32, %v323_v12  ;;  %v198_v17 = vadd.f32 %v1319_v58, %v103_v5  ;;  %v234_v18 = vadd.f32 %v1323_v60, %v133_v38 }
  0xbe   :  { %v398_v7 = vmul.f32 %v393_v28, %v1397_v52  ;;  %v434_v14 = vmul.f32 %v429_v8, %v1397_v52  ;;  %v102_v22 = vrot.slane %v1249_v46, %v1284_v62  ;;  %v132_v20 = vrot.slane %v1249_v46, %v1287_v63 }
  0xbf   :  { %v335_v45 = vadd.f32 %v333_v57, %v234_v18  ;;  %v353_v58 = vmul.f32 %v351_v21, %v342_v2  ;;  %v532_v60 = vrot.slane %v1235_v36, %v1287_v63  ;;  %v280_v31 = vrot.slane %v1417_v27, %v1255_v48  ;;  %v523_v18 = vpop.permute.xlu0 %522 }
  0xc0   :  { %v1428_v16 = vpop.permute.xlu1 %455  ;;  %v320_v32 = vrot.slane %v1417_v27, %v1258_v49  ;;  %v264_v46 = vrot.slane %v1417_v27, %v1230_v35  ;;  %v308_v5 = vrot.slane %v1417_v27, %v1252_v47  ;;  %v134_v57 = vmul.f32 %v132_v20, %v1265_v53 }
  0xc1   :  { %v466_v39 = vmul.f32 %v461_v29, %v1428_v16  ;;  %v506_v41 = vmul.f32 %v501_v30, %v1428_v16  ;;  %v299_v30 = vadd.f32 %v297_v13, %v198_v17  ;;  %v436_v3 = vadd.f32 %v434_v14, %v335_v45 }
  0xc2   :  { %v104_v13 = vmul.f32 %v102_v22, %v1265_v53  ;;  %v536_v2 = vrot.slane %v1240_v37, %v1287_v63  ;;  %v1467_v28 = vrot.slane %v1235_v36, %v632_v11  ;;  %v365_v8 = vrot.slane %v353_v58, %v1230_v35 }
  0xc3   :  { %v1441_v54 = vadd.f32 %v466_v39, %v384_v15  ;;  %v1443_v29 = vadd.f32 %v506_v41, %v424_v19  ;;  %v400_v0 = vadd.f32 %v398_v7, %v299_v30  ;;  %v409_v15 = vrot.slane %v353_v58, %v1252_v47 }
  0xc4   :  { %v266_v53 = vmul.f32 %v264_v46, %v1327_v1  ;;  %v310_v41 = vmul.f32 %v308_v5, %v1327_v1  ;;  %v381_v7 = vrot.slane %v353_v58, %v1255_v48  ;;  %v421_v14 = vrot.slane %v353_v58, %v1258_v49 }
  0xc5   :  { %v1458_v38 = vpop.permute.xlu1 %471  ;;  %v1482_v22 = vrot.slane %v1240_v37, %v632_v11  ;;  %v733_v20 = vsub.s32 7, %v1225_v33  ;;  %v199_v30 = vadd.f32 %v1321_v59, %v104_v13  ;;  %v235_v45 = vadd.f32 %v1325_v61, %v134_v57 }
  0xc6   :  { %v482_v21 = vmul.f32 %v477_v43, %v1458_v38  ;;  %v518_v12 = vmul.f32 %v513_v50, %v1458_v38  ;;  %v282_v43 = vmul.f32 %v280_v31, %v1335_v6  ;;  %v322_v50 = vmul.f32 %v320_v32, %v1335_v6 }
  0xc7   :  { %v296_v6 = vrot.slane %v1417_v27, %v1284_v62  ;;  %v332_v1 = vrot.slane %v1417_v27, %v1287_v63  ;;  %v367_v31 = vmul.f32 %v365_v8, %v1341_v10  ;;  %v411_v32 = vmul.f32 %v409_v15, %v1341_v10 }
  0xc8   :  { %v1471_v19 = vadd.f32 %v482_v21, %v400_v0  ;;  %v1473_v39 = vadd.f32 %v518_v12, %v436_v3  ;;  %v284_v59 = vadd.f32 %v282_v43, %v1305_v40  ;;  %v324_v61 = vadd.f32 %v322_v50, %v1309_v42 }
  0xc9   :  { %v525_v17 = vpop.permute.xlu1 %524  ;;  %v268_v46 = vadd.f32 %v266_v53, %v1311_v44  ;;  %v312_v5 = vadd.f32 %v310_v41, %v1313_v51  ;;  %v298_v27 = vmul.f32 %v296_v6, %v1339_v9  ;;  %v334_v10 = vmul.f32 %v332_v1, %v1339_v9 }
  0xca   :  { %v527_v11 = vsel %vm526_vm4, %v523_v18, %v525_v17  ;;  %v528_v33 = vsel %vm526_vm4, %v525_v17, %v523_v18  ;;  %v383_v3 = vmul.f32 %v381_v7, %v1367_v26  ;;  %v423_v21 = vmul.f32 %v421_v14, %v1367_v26 }
  0xcb   :  { %v397_v12 = vrot.slane %v353_v58, %v1284_v62  ;;  %v433_v40 = vrot.slane %v353_v58, %v1287_v63  ;;  %v1508_v42 = vmul.f32 %v532_v60, %v527_v11  ;;  %v1510_v44 = vmul.f32 %v536_v2, %v528_v33  ;;  %v541_v60 = vpop.permute.xlu0 %540 }
  0xcc   :  { %v369_v51 = vadd.f32 %v367_v31, %v268_v46  ;;  %v413_v13 = vadd.f32 %v411_v32, %v312_v5  ;;  %v451_v57 = vmul.f32 %v449_v23, %v1365_v25  ;;  %v495_v9 = vmul.f32 %v493_v24, %v1365_v25 }
  0xcd   :  { %v557_v0 = vpop.permute.xlu1 %556  ;;  %v399_v26 = vmul.f32 %v397_v12, %v1397_v52  ;;  %v435_v58 = vmul.f32 %v433_v40, %v1397_v52  ;;  %v1523_v2 = vrot.slane %v1235_v36, %v733_v20  ;;  %v1526_v8 = vrot.slane %v1240_v37, %v733_v20 }
  0xce   :  { %v300_v15 = vadd.f32 %v298_v27, %v199_v30  ;;  %v336_v43 = vadd.f32 %v334_v10, %v235_v45  ;;  %v385_v50 = vadd.f32 %v383_v3, %v284_v59  ;;  %v425_v23 = vadd.f32 %v423_v21, %v324_v61 }
  0xcf   :  { %v1662_v24 = vrot.slane %v1174_v4, %v1255_v48  ;;  %v1663_v52 = vrot.slane %v1174_v4, %v1258_v49  ;;  %v562_v36 = vrot.slane %v1508_v42, %v1255_v48  ;;  %v566_v37 = vrot.slane %v1510_v44, %v1255_v48  ;;  %v624_v31 = vpop.permute.xlu0 %623 }
  0xd0   :  { %v453_v17 = vadd.f32 %v451_v57, %v369_v51  ;;  %v497_v18 = vadd.f32 %v495_v9, %v413_v13  ;;  %v1664_v7 = vrot.slane %v1174_v4, %v1284_v62  ;;  %v1665_v20 = vrot.slane %v1174_v4, %v1287_v63 }
  0xd1   :  { %v467_v25 = vmul.f32 %v1662_v24, %v1428_v16  ;;  %v507_v41 = vmul.f32 %v1663_v52, %v1428_v16  ;;  %v401_v45 = vadd.f32 %v399_v26, %v300_v15  ;;  %v437_v16 = vadd.f32 %v435_v58, %v336_v43 }
  0xd2   :  { %v573_v53 = vpop.permute.xlu1 %572  ;;  %v483_v14 = vmul.f32 %v1664_v7, %v1458_v38  ;;  %v519_v30 = vmul.f32 %v1665_v20, %v1458_v38  ;;  %v602_v6 = vrot.slane %v1508_v42, %v1258_v49  ;;  %v606_v1 = vrot.slane %v1510_v44, %v1258_v49 }
  0xd3   :  { %v546_v32 = vrot.slane %v1508_v42, %v1230_v35  ;;  %v550_v11 = vrot.slane %v1510_v44, %v1230_v35  ;;  %v590_v33 = vrot.slane %v1508_v42, %v1252_v47  ;;  %v594_v4 = vrot.slane %v1510_v44, %v1252_v47 }
  0xd4   :  { %v469_v59 = vadd.f32 %v467_v25, %v385_v50  ;;  %v509_v61 = vadd.f32 %v507_v41, %v425_v23  ;;  %v567_v46 = vmul.f32 %v562_v36, %v557_v0  ;;  %v568_v5 = vmul.f32 %v566_v37, %v557_v0 }
  0xd5   :  { %v485_v27 = vadd.f32 %v483_v14, %v401_v45  ;;  %v521_v10 = vadd.f32 %v519_v30, %v437_v16  ;;  %v607_v12 = vmul.f32 %v602_v6, %v557_v0  ;;  %v608_v40 = vmul.f32 %v606_v1, %v557_v0  ;;  %v642_v30 = vpop.permute.xlu0 %641 }
  0xd6   :  { %v626_v38 = vpop.permute.xlu1 %625  ;;  %v551_v57 = vmul.f32 %v546_v32, %v541_v60  ;;  %v552_v9 = vmul.f32 %v550_v11, %v541_v60  ;;  %v595_v26 = vmul.f32 %v590_v33, %v541_v60  ;;  %v596_v58 = vmul.f32 %v594_v4, %v541_v60 }
  0xd7   :  { %v628_v3 = vsel %vm627_vm5, %v624_v31, %v626_v38  ;;  %v629_v21 = vsel %vm627_vm5, %v626_v38, %v624_v31  ;;  %v569_v43 = vadd.f32 %v567_v46, %v1441_v54  ;;  %v570_v50 = vadd.f32 %v568_v5, %v469_v59 }
  0xd8   :  { %v1565_v51 = vmul.f32 %v1467_v28, %v628_v3  ;;  %v1568_v13 = vmul.f32 %v1482_v22, %v629_v21  ;;  %v578_v23 = vrot.slane %v1508_v42, %v1284_v62  ;;  %v582_v28 = vrot.slane %v1510_v44, %v1284_v62 }
  0xd9   :  { %v614_v22 = vrot.slane %v1508_v42, %v1287_v63  ;;  %v618_v0 = vrot.slane %v1510_v44, %v1287_v63  ;;  %v609_v54 = vadd.f32 %v607_v12, %v1443_v29  ;;  %v610_v25 = vadd.f32 %v608_v40, %v509_v61  ;;  %v725_v12 = vpop.permute.xlu0 %724 }
  0xda   :  { %v658_v15 = vpop.permute.xlu1 %657  ;;  %v663_v24 = vrot.slane %v1565_v51, %v1255_v48  ;;  %v667_v60 = vrot.slane %v1568_v13, %v1255_v48  ;;  %v583_v52 = vmul.f32 %v578_v23, %v573_v53  ;;  %v584_v41 = vmul.f32 %v582_v28, %v573_v53 }
  0xdb   :  { %v619_v36 = vmul.f32 %v614_v22, %v573_v53  ;;  %v620_v37 = vmul.f32 %v618_v0, %v573_v53  ;;  %v703_v7 = vrot.slane %v1565_v51, %v1258_v49  ;;  %v707_v42 = vrot.slane %v1568_v13, %v1258_v49 }
  0xdc   :  { %v647_v44 = vrot.slane %v1565_v51, %v1230_v35  ;;  %v651_v14 = vrot.slane %v1568_v13, %v1230_v35  ;;  %v691_v29 = vrot.slane %v1565_v51, %v1252_v47  ;;  %v695_v20 = vrot.slane %v1568_v13, %v1252_v47 }
  0xdd   :  { %v553_v45 = vadd.f32 %v551_v57, %v1409_v55  ;;  %v554_v16 = vadd.f32 %v552_v9, %v453_v17  ;;  %v668_v6 = vmul.f32 %v663_v24, %v658_v15  ;;  %v669_v1 = vmul.f32 %v667_v60, %v658_v15 }
  0xde   :  { %v597_v31 = vadd.f32 %v595_v26, %v1411_v56  ;;  %v598_v32 = vadd.f32 %v596_v58, %v497_v18  ;;  %v585_v11 = vadd.f32 %v583_v52, %v1471_v19  ;;  %v586_v33 = vadd.f32 %v584_v41, %v485_v27 }
  0xdf   :  { %v674_v53 = vpop.permute.xlu1 %673  ;;  %v621_v4 = vadd.f32 %v619_v36, %v1473_v39  ;;  %v622_v38 = vadd.f32 %v620_v37, %v521_v10  ;;  %v708_v59 = vmul.f32 %v703_v7, %v658_v15  ;;  %v709_v61 = vmul.f32 %v707_v42, %v658_v15  ;;  %v743_v36 = vpop.permute.xlu0 %742 }
  0xe0   :  { %v652_v46 = vmul.f32 %v647_v44, %v642_v30  ;;  %v653_v5 = vmul.f32 %v651_v14, %v642_v30  ;;  %v696_v3 = vmul.f32 %v691_v29, %v642_v30  ;;  %v697_v21 = vmul.f32 %v695_v20, %v642_v30 }
  0xe1   :  { %v670_v17 = vadd.f32 %v668_v6, %v569_v43  ;;  %v671_v40 = vadd.f32 %v669_v1, %v570_v50  ;;  %v679_v39 = vrot.slane %v1565_v51, %v1284_v62  ;;  %v683_v18 = vrot.slane %v1568_v13, %v1284_v62 }
  0xe2   :  { %v715_v27 = vrot.slane %v1565_v51, %v1287_v63  ;;  %v719_v10 = vrot.slane %v1568_v13, %v1287_v63  ;;  %v710_v57 = vadd.f32 %v708_v59, %v609_v54  ;;  %v711_v9 = vadd.f32 %v709_v61, %v610_v25 }
  0xe3   :  { %v727_v55 = vpop.permute.xlu1 %726  ;;  %v684_v15 = vmul.f32 %v679_v39, %v674_v53  ;;  %v685_v43 = vmul.f32 %v683_v18, %v674_v53  ;;  %v654_v54 = vadd.f32 %v652_v46, %v553_v45  ;;  %v655_v25 = vadd.f32 %v653_v5, %v554_v16 }
  0xe4   :  { %v729_v56 = vsel %vm728_vm6, %v725_v12, %v727_v55  ;;  %v730_v19 = vsel %vm728_vm6, %v727_v55, %v725_v12  ;;  %v720_v50 = vmul.f32 %v715_v27, %v674_v53  ;;  %v721_v23 = vmul.f32 %v719_v10, %v674_v53 }
  0xe5   :  { %v739_v26 = vmul.f32 %v1523_v2, %v729_v56  ;;  %v740_v58 = vmul.f32 %v1526_v8, %v730_v19  ;;  %v698_v52 = vadd.f32 %v696_v3, %v597_v31  ;;  %v699_v41 = vadd.f32 %v697_v21, %v598_v32 }
  0xe6   :  { %v686_v14 = vadd.f32 %v684_v15, %v585_v11  ;;  %v687_v29 = vadd.f32 %v685_v43, %v586_v33  ;;  %v722_v20 = vadd.f32 %v720_v50, %v621_v4  ;;  %v723_v30 = vadd.f32 %v721_v23, %v622_v38  ;;  %v972_v33 = vld [vmem:[%s1658_s2 + $0x10] ss:$0 sm:$0xff]  ;;  %v973_v4 = vld [vmem:[%s1658_s2 + $0x18] ss:$0 sm:$0xff]  ;;  %v826_v38 = vpop.permute.xlu0 %825  ;;  %s1121_s2 = smov [#allocation5]  }
  0xe7   :  { %v759_v28 = vpop.permute.xlu1 %758  ;;  %v748_v22 = vrot.slane %v739_v26, %v1230_v35  ;;  %v752_v51 = vrot.slane %v740_v58, %v1230_v35  ;;  %v792_v0 = vrot.slane %v739_v26, %v1252_v47  ;;  %v796_v13 = vrot.slane %v740_v58, %v1252_v47  ;;  %s960_s19 = sshll.u32 %s1121_s2, 4  ;;  %s961_s19 = int_to_ptr.vmem [resolvable:$true] %s960_s19 }
  0xe8   :  { %v764_v24 = vrot.slane %v739_v26, %v1255_v48  ;;  %v768_v2 = vrot.slane %v740_v58, %v1255_v48  ;;  %v804_v8 = vrot.slane %v739_v26, %v1258_v49  ;;  %v808_v60 = vrot.slane %v740_v58, %v1258_v49  ;;  %s1060_s20 = scalar_lea.vmem %s961_s19, 512  ;;  %p1065_p6 = scmp.lt.s32.totalorder %s961_s19, %s961_s19 }
  0xe9   :  { %v753_v37 = vmul.f32 %v748_v22, %v743_v36  ;;  %v754_v7 = vmul.f32 %v752_v51, %v743_v36  ;;  %v797_v42 = vmul.f32 %v792_v0, %v743_v36  ;;  %v798_v44 = vmul.f32 %v796_v13, %v743_v36  ;;  %p1061_p5 = scmp.ne.s32.totalorder %s961_s19, %s1060_s20  ;;  %p1066_p7 = scmp.lt.s32.totalorder %s1060_s20, %s1060_s20 }
  0xea   :  { %v769_v6 = vmul.f32 %v764_v24, %v759_v28  ;;  %v770_v1 = vmul.f32 %v768_v2, %v759_v28  ;;  %v809_v59 = vmul.f32 %v804_v8, %v759_v28  ;;  %v810_v61 = vmul.f32 %v808_v60, %v759_v28  ;;  %v844_v24 = vpop.permute.xlu0 %843 }
  0xeb   :  { %v780_v12 = vrot.slane %v739_v26, %v1284_v62  ;;  %v784_v45 = vrot.slane %v740_v58, %v1284_v62  ;;  %v816_v16 = vrot.slane %v739_v26, %v1287_v63  ;;  %v820_v31 = vrot.slane %v740_v58, %v1287_v63  ;;  %p1067_p8 = por %p1066_p7, %p1065_p6 }
  0xec   :  { %v775_v53 = vpop.permute.xlu1 %774  ;;  %v755_v32 = vadd.f32 %v753_v37, %v654_v54  ;;  %v756_v46 = vadd.f32 %v754_v7, %v655_v25  ;;  %v799_v5 = vadd.f32 %v797_v42, %v698_v52  ;;  %v800_v11 = vadd.f32 %v798_v44, %v699_v41 }
  0xed   :  { %v785_v3 = vmul.f32 %v780_v12, %v775_v53  ;;  %v786_v21 = vmul.f32 %v784_v45, %v775_v53  ;;  %v821_v55 = vmul.f32 %v816_v16, %v775_v53  ;;  %v822_v56 = vmul.f32 %v820_v31, %v775_v53  ;;  %p1068_p9 = pnand %p1067_p8, %p1061_p5 }
  0xee   :  { %v771_v39 = vadd.f32 %v769_v6, %v670_v17  ;;  %v772_v18 = vadd.f32 %v770_v1, %v671_v40  ;;  %v811_v26 = vadd.f32 %v809_v59, %v710_v57  ;;  %v812_v58 = vadd.f32 %v810_v61, %v711_v9 }
  0xef   :  { %v787_v50 = vadd.f32 %v785_v3, %v686_v14  ;;  %v788_v23 = vadd.f32 %v786_v21, %v687_v29  ;;  %v823_v28 = vadd.f32 %v821_v55, %v722_v20  ;;  %v824_v22 = vadd.f32 %v822_v56, %v723_v30  ;;  %v937_v3 = vld [vmem:[#allocation2] sm:$0xff]  ;;  %v938_v56 = vld [vmem:[#allocation2 + $0x8] sm:$0xff] }
  0xf0   :  { %v828_v19 = vpop.permute.xlu1 %827 }
  0xf1   :  { %v830_v27 = vsel %vm829_vm7, %v826_v38, %v828_v19  ;;  %v831_v10 = vsel %vm829_vm7, %v828_v19, %v826_v38  ;;  %v950_v19 = vld [vmem:[#allocation2 + $0x18] sm:$0xff] }
  0xf2   :  { %v840_v15 = vmul.f32 %v972_v33, %v830_v27  ;;  %v841_v43 = vmul.f32 %v973_v4, %v831_v10  ;;  %v933_v4 = vpop.permute.xlu0 %932 }
  0xf4   :  { %v860_v51 = vpop.permute.xlu1 %859  ;;  %v865_v0 = vrot.slane %v840_v15, %v1255_v48  ;;  %v869_v17 = vrot.slane %v841_v43, %v1255_v48  ;;  %v905_v40 = vrot.slane %v840_v15, %v1258_v49  ;;  %v909_v13 = vrot.slane %v841_v43, %v1258_v49 }
  0xf5   :  { %v849_v34 = vrot.slane %v840_v15, %v1230_v35  ;;  %v853_v57 = vrot.slane %v841_v43, %v1230_v35  ;;  %v893_v9 = vrot.slane %v840_v15, %v1252_v47  ;;  %v897_v2 = vrot.slane %v841_v43, %v1252_v47 }
  0xf6   :  { %v870_v8 = vmul.f32 %v865_v0, %v860_v51  ;;  %v871_v60 = vmul.f32 %v869_v17, %v860_v51  ;;  %v910_v54 = vmul.f32 %v905_v40, %v860_v51  ;;  %v911_v25 = vmul.f32 %v909_v13, %v860_v51 }
  0xf7   :  { %v854_v52 = vmul.f32 %v849_v34, %v844_v24  ;;  %v855_v41 = vmul.f32 %v853_v57, %v844_v24  ;;  %v898_v48 = vmul.f32 %v893_v9, %v844_v24  ;;  %v899_v36 = vmul.f32 %v897_v2, %v844_v24 }
  0xf8   :  { %v872_v37 = vadd.f32 %v870_v8, %v771_v39  ;;  %v873_v7 = vadd.f32 %v871_v60, %v772_v18  ;;  %v912_v49 = vadd.f32 %v910_v54, %v811_v26  ;;  %v913_v42 = vadd.f32 %v911_v25, %v812_v58 }
  0xf9   :  { %v856_v44 = vadd.f32 %v854_v52, %v755_v32  ;;  %v857_v14 = vadd.f32 %v855_v41, %v756_v46  ;;  %v900_v29 = vadd.f32 %v898_v48, %v799_v5  ;;  %v901_v35 = vadd.f32 %v899_v36, %v800_v11  ;;  %v876_v20 = vpop.permute.xlu1 %875 }
  0xfa   :  { %v881_v30 = vrot.slane %v840_v15, %v1284_v62  ;;  %v885_v47 = vrot.slane %v841_v43, %v1284_v62  ;;  %v917_v53 = vrot.slane %v840_v15, %v1287_v63  ;;  %v921_v6 = vrot.slane %v841_v43, %v1287_v63  ;;  %v949_v63 = vld [vmem:[#allocation2 + $0x10] sm:$0xff] }
  0xfb   :  { %v927_v1 = vadd.f32 %v873_v7, %v857_v14  ;;  %v944_v59 = vadd.f32 %v913_v42, %v901_v35  ;;  %v926_v61 = vadd.f32 %v872_v37, %v856_v44  ;;  %v943_v12 = vadd.f32 %v912_v49, %v900_v29 }
  0xfc   :  { %v886_v45 = vmul.f32 %v881_v30, %v876_v20  ;;  %v887_v16 = vmul.f32 %v885_v47, %v876_v20  ;;  %v922_v31 = vmul.f32 %v917_v53, %v876_v20  ;;  %v923_v32 = vmul.f32 %v921_v6, %v876_v20 }
  0xfe   :  { %v888_v46 = vadd.f32 %v886_v45, %v787_v50  ;;  %v889_v5 = vadd.f32 %v887_v16, %v788_v23  ;;  %v924_v11 = vadd.f32 %v922_v31, %v823_v28  ;;  %v925_v33 = vadd.f32 %v923_v32, %v824_v22 }
 0x100   :  { %v929_v38 = vadd.f32 %v927_v1, %v889_v5  ;;  %v946_v62 = vadd.f32 %v944_v59, %v925_v33  ;;  %v928_v21 = vadd.f32 %v926_v61, %v888_v46  ;;  %v945_v55 = vadd.f32 %v943_v12, %v924_v11 }
 0x102   :  { %v935_v39 = vadd.f32 %v933_v4, %v928_v21  ;;  %v936_v18 = vadd.f32 %v933_v4, %v929_v38  ;;  %v947_v27 = vadd.f32 %v945_v55, %v933_v4  ;;  %v948_v10 = vadd.f32 %v946_v62, %v933_v4 }
 0x104   :  { %v939_v26 = vsub.f32 %v937_v3, %v935_v39  ;;  %v940_v58 = vsub.f32 %v938_v56, %v936_v18  ;;  %v951_v15 = vsub.f32 %v949_v63, %v947_v27  ;;  %v952_v43 = vsub.f32 %v950_v19, %v948_v10 }
 0x106   :  { %941 = vst [vmem:[#allocation5] sm:$0xff] %v939_v26  ;;  %942 = vst [vmem:[#allocation5 + $0x8] sm:$0xff] %v940_v58 }
 0x107   :  { %953 = vst [vmem:[#allocation5 + $0x10] sm:$0xff] %v951_v15  ;;  %954 = vst [vmem:[#allocation5 + $0x18] sm:$0xff] %v952_v43 }
 0x108   :  { %1071 = shalt.err (!%p1068_p9)
}
 0x109   :  { %966 = dma.vmem_to_hbm [thread:$0]  %s961_s19, 512, %s1661_s5, [#allocation4], %s1085_s21, %s1085_s21, %s1086_s22  }
 0x10a   :  { %1082 = dma.done.wait [#allocation4], 512  }
 0x10b   :  { %1083 = vsyncadd [#allocation4], 4294966784 }
 0x10c   :  { %970 = vsyncpa [#allocation3], 1 }
 0x10d   :  { %971 = vsyncpa [#allocation4], 1 }

</bundles_post_ra>
